<compile_context>
chip_gen: v7x
topology: tpu7x:2x2x1
jax: 0.10.0
libtpu: 0.0.40
codegen_flags: <defaults>
</compile_context>

<pallas_src>
import math
from dataclasses import dataclass

import jax
import jax.numpy as jnp
from jax import lax
from jax.experimental import pallas as pl
from jax.experimental.pallas import tpu as pltpu


@dataclass
class Config:
    vocab_size: int = 64
    d_model: int = 32
    num_heads: int = 4
    num_layers: int = 2
    seq_len: int = 8
    hidden_dim: int = 64
    q_lora_rank: int = 16
    kv_lora_rank: int = 16
    nope_head_dim: int = 8
    rope_head_dim: int = 8
    v_head_dim: int = 8
    rms_eps: float = 1e-6


# ----------------------------------------------------------------------------
# kernel
# ----------------------------------------------------------------------------
def _rms(x, g, eps):
    ms = jnp.mean(x * x, axis=-1, keepdims=True)
    return x * lax.rsqrt(ms + eps) * g


def make_fused_kernel(cfg: Config):
    H = cfg.num_heads
    dn = cfg.nope_head_dim
    dr = cfg.rope_head_dim
    dv = cfg.v_head_dim
    dr2 = dr // 2
    dqk = dn + dr
    D = cfg.d_model
    qr = cfg.q_lora_rank
    kvr = cfg.kv_lora_rank
    eps = cfg.rms_eps
    scale = 1.0 / math.sqrt(dn + dr)

    def kernel(x_ref, mask_ref, cosq_ref, sinq_ref, cosk_ref, sink_ref,
               gn_ref, wvoc_ref,
               gains_ref, wh1_ref, wq_ref, wkv_ref, wo_ref, w1_ref, w2_ref,
               out_ref, x_sc):
        layer = pl.program_id(1)

        # Activation is resident in VMEM scratch across the layer axis;
        # load it from HBM exactly once per batch block.
        @pl.when(layer == 0)
        def _():
            x_sc[...] = x_ref[...]

        x = x_sc[...]                                     # (rows, D) f32

        # packed RMSNorm gains: [g1 | g2 | qg | kvg]
        gains = gains_ref[...]                            # (1, 2D+qr+kvr)
        g1 = gains[:, :D]
        g2 = gains[:, D:2 * D]
        qg = gains[:, 2 * D:2 * D + qr]
        kvg = gains[:, 2 * D + qr:]

        h1 = _rms(x, g1, eps)                             # norm1 (f32)
        h1b = h1.astype(jnp.bfloat16)

        # ---- fused low-rank projections: one matmul for [wcq | wckv | wkr] ----
        h1p = jnp.dot(h1b, wh1_ref[...], preferred_element_type=jnp.float32)
        cq = _rms(h1p[:, :qr], qg, eps)                   # q_norm
        ckv = _rms(h1p[:, qr:qr + kvr], kvg, eps)         # kv_norm
        k_rope = h1p[:, qr + kvr:]                        # (rows, dr) shared head

        q_all = jnp.dot(cq.astype(jnp.bfloat16), wq_ref[...],
                        preferred_element_type=jnp.float32)   # (rows, H*dn+H*dr)
        kv_all = jnp.dot(ckv.astype(jnp.bfloat16), wkv_ref[...],
                         preferred_element_type=jnp.float32)  # (rows, H*dn+H*dv)

        # ---- wide-slab RoPE (all heads at once, de-interleaved basis) ----
        cosq, sinq = cosq_ref[...], sinq_ref[...]         # (rows, H*dr2)
        cosk, sink = cosk_ref[...], sink_ref[...]         # (rows, dr2)

        q_nope = q_all[:, :H * dn]
        qe = q_all[:, H * dn:H * dn + H * dr2]
        qo = q_all[:, H * dn + H * dr2:]
        qe_r = qe * cosq - qo * sinq
        qo_r = qe * sinq + qo * cosq

        k_nope = kv_all[:, :H * dn]
        v_slab = kv_all[:, H * dn:].astype(jnp.bfloat16)  # (rows, H*dv)
        ke, ko = k_rope[:, :dr2], k_rope[:, dr2:]
        k_rot = jnp.concatenate([ke * cosk - ko * sink,
                                 ke * sink + ko * cosk], axis=1)  # (rows, dr)

        # ---- assemble per-head-contiguous Q/K slabs ONCE (outside head loop) ----
        q_parts, k_parts = [], []
        for hh in range(H):
            q_parts += [q_nope[:, hh * dn:(hh + 1) * dn],
                        qe_r[:, hh * dr2:(hh + 1) * dr2],
                        qo_r[:, hh * dr2:(hh + 1) * dr2]]
            k_parts += [k_nope[:, hh * dn:(hh + 1) * dn], k_rot]
        q_slab = jnp.concatenate(q_parts, axis=1).astype(jnp.bfloat16)  # (rows, H*dqk)
        k_slab = jnp.concatenate(k_parts, axis=1).astype(jnp.bfloat16)  # (rows, H*dqk)

        mask = mask_ref[...]                              # (rows, rows) additive f32

        # ---- attention: per head, one score dot + one PV dot over all TB seqs ----
        # Cross-sequence score entries are killed by the block-diagonal mask.
        o_heads = []
        for hh in range(H):
            qh = q_slab[:, hh * dqk:(hh + 1) * dqk]
            kh = k_slab[:, hh * dqk:(hh + 1) * dqk]
            s = lax.dot_general(qh, kh, (((1,), (1,)), ((), ())),
                                preferred_element_type=jnp.float32)
            s = s * scale + mask
            m = jnp.max(s, axis=-1, keepdims=True)
            p = jnp.exp(s - m)
            p = p * pl.reciprocal(jnp.sum(p, axis=-1, keepdims=True), approx=True)
            o_heads.append(jnp.dot(p.astype(jnp.bfloat16),
                                   v_slab[:, hh * dv:(hh + 1) * dv],
                                   preferred_element_type=jnp.float32))
        o_cat = jnp.concatenate(o_heads, axis=1)          # (rows, H*dv)
        attn = jnp.dot(o_cat.astype(jnp.bfloat16), wo_ref[...],
                       preferred_element_type=jnp.float32)

        x1 = x + attn                                     # residual 1 (f32)

        # ---- MLP: RMSNorm -> Linear -> SiLU -> Linear ----
        h2 = _rms(x1, g2, eps)
        m1 = jnp.dot(h2.astype(jnp.bfloat16), w1_ref[...],
                     preferred_element_type=jnp.float32)
        m1 = m1 * jax.nn.sigmoid(m1)                      # SiLU in f32
        x2 = x1 + jnp.dot(m1.astype(jnp.bfloat16), w2_ref[...],
                          preferred_element_type=jnp.float32)  # residual 2
        x_sc[...] = x2

        # ---- final norm + (lane-padded) vocab projection on the last layer ----
        # TODO(synk): for large vocab/d_model (esp. v7x 64MiB VMEM), split this
        # into its own V-tiled pallas_call instead of keeping wvoc resident.
        @pl.when(layer == pl.num_programs(1) - 1)
        def _():
            hf = _rms(x2, gn_ref[...], eps)
            out_ref[...] = jnp.dot(hf.astype(jnp.bfloat16), wvoc_ref[...],
                                   preferred_element_type=jnp.float32)

    return kernel


# ----------------------------------------------------------------------------
# wrapper (glue)
# ----------------------------------------------------------------------------
def _pick_tb(batch, seq):
    # Largest divisor of batch with tb*seq <= ~256 rows (MXU M fill on v6e/v7x).
    target = max(1, 256 // max(seq, 1))
    tb = 1
    for d in range(1, batch + 1):
        if batch % d == 0 and d <= target:
            tb = d
    return tb


def transformer_forward(tokens, params, cfg: Config):
    B, S = tokens.shape
    H = cfg.num_heads
    D, V, L = cfg.d_model, cfg.vocab_size, cfg.num_layers
    dr2 = cfg.rope_head_dim // 2

    tb = _pick_tb(B, S)
    rows = tb * S
    Vpad = params['vocab_w'].shape[1]                      # lane-padded in init

    # embedding gather kept as XLA glue
    x2d = params['token_emb'][tokens].reshape(B * S, D).astype(jnp.float32)

    cos = params['freq_cos'][:S]                           # (S, dr2)
    sin = params['freq_sin'][:S]
    cosq = jnp.tile(jnp.tile(cos, (1, H)), (tb, 1))        # (rows, H*dr2)
    sinq = jnp.tile(jnp.tile(sin, (1, H)), (tb, 1))
    cosk = jnp.tile(cos, (tb, 1))                          # (rows, dr2)
    sink = jnp.tile(sin, (tb, 1))

    # block-diagonal (per-sequence) + causal ADDITIVE mask, finite negative
    pos = jnp.arange(rows)
    same_seq = (pos[:, None] // S) == (pos[None, :] // S)
    causal = (pos[:, None] % S) >= (pos[None, :] % S)
    mask = jnp.where(same_seq & causal, 0.0, -1e30).astype(jnp.float32)

    lw = params['layers']                                  # stacked per-layer weights

    def const_spec(a):
        return pl.BlockSpec(a.shape, lambda b, l: (0, 0))

    def stacked_spec(a):
        return pl.BlockSpec((None,) + a.shape[1:], lambda b, l: (l, 0, 0))

    stacked_names = ('gains', 'wh1', 'wq', 'wkv', 'wo', 'w1', 'w2')
    inputs = (x2d, mask, cosq, sinq, cosk, sink,
              params['norm_g'], params['vocab_w'],
              *[lw[k] for k in stacked_names])

    in_specs = ([pl.BlockSpec((rows, D), lambda b, l: (b, 0)),
                 const_spec(mask), const_spec(cosq), const_spec(sinq),
                 const_spec(cosk), const_spec(sink),
                 const_spec(params['norm_g']), const_spec(params['vocab_w'])]
                + [stacked_spec(lw[k]) for k in stacked_names])

    out = pl.pallas_call(
        make_fused_kernel(cfg),
        out_shape=jax.ShapeDtypeStruct((B * S, Vpad), jnp.float32),
        grid_spec=pltpu.PrefetchScalarGridSpec(
            num_scalar_prefetch=0,
            grid=(B // tb, L),
            in_specs=in_specs,
            # NOTE: out index_map constant across the layer axis (resident
            # output, written only on the last layer step).
            out_specs=pl.BlockSpec((rows, Vpad), lambda b, l: (b, 0)),
            scratch_shapes=[pltpu.VMEM((rows, D), jnp.float32)]),
        compiler_params=pltpu.CompilerParams(
            dimension_semantics=("parallel", "arbitrary"),
            vmem_limit_bytes=64 * 1024 * 1024),
    )(*inputs)
    return out[:, :V].reshape(B, S, V)


# ----------------------------------------------------------------------------
# deterministic parameter construction
# ----------------------------------------------------------------------------
def precompute_freqs_cis(dim, end, theta=10000.0):
    freqs = 1.0 / (theta ** (jnp.arange(0, dim, 2)[: dim // 2].astype(jnp.float32) / dim))
    t = jnp.arange(end, dtype=jnp.float32)
    freqs = jnp.outer(t, freqs)
    return jnp.cos(freqs), jnp.sin(freqs)                  # (end, dim//2) each


def trunc_normal(key, shape, std):
    return (std * jax.random.truncated_normal(key, -3.0, 3.0, shape)).astype(jnp.float32)


def _rope_deinterleave_cols(num_heads, dr):
    # reorder rope columns so ALL heads' even components come first, then odds
    evens = [h * dr + i for h in range(num_heads) for i in range(0, dr, 2)]
    odds = [h * dr + i for h in range(num_heads) for i in range(1, dr, 2)]
    return jnp.array(evens + odds, dtype=jnp.int32)


def init_params(cfg: Config, key):
    std = cfg.d_model ** (-0.5)
    H, dn, dr, dv = cfg.num_heads, cfg.nope_head_dim, cfg.rope_head_dim, cfg.v_head_dim
    D, L, V = cfg.d_model, cfg.num_layers, cfg.vocab_size
    qr, kvr = cfg.q_lora_rank, cfg.kv_lora_rank
    Vpad = ((V + 127) // 128) * 128                         # lane-dense logits

    keys = iter(jax.random.split(key, 2 + 10 * L))
    vocab_w = trunc_normal(next(keys), (D, V), std)
    if Vpad > V:
        vocab_w = jnp.concatenate(
            [vocab_w, jnp.zeros((D, Vpad - V), jnp.float32)], axis=1)

    params = {
        'token_emb': trunc_normal(next(keys), (V, D), 0.02),
        'vocab_w': vocab_w.astype(jnp.bfloat16),
        'norm_g': jnp.ones((1, D), jnp.float32),
    }
    cos, sin = precompute_freqs_cis(dr, cfg.seq_len * 2)
    params['freq_cos'], params['freq_sin'] = cos, sin

    permH = _rope_deinterleave_cols(H, dr)
    perm1 = _rope_deinterleave_cols(1, dr)

    gains_l, wh1_l, wq_l, wkv_l, wo_l, w1_l, w2_l = ([] for _ in range(7))
    for _ in range(L):
        wq_nope = trunc_normal(next(keys), (qr, H * dn), std)
        wq_rope = trunc_normal(next(keys), (qr, H * dr), std)[:, permH]
        wcq = trunc_normal(next(keys), (D, qr), std)
        wckv = trunc_normal(next(keys), (D, kvr), std)
        wk_nope = trunc_normal(next(keys), (kvr, H * dn), std)
        wv = trunc_normal(next(keys), (kvr, H * dv), std)
        wk_rope = trunc_normal(next(keys), (D, dr), std)[:, perm1]
        wo = trunc_normal(next(keys), (H * dv, D), std)
        w1 = trunc_normal(next(keys), (D, cfg.hidden_dim), std)
        w2 = trunc_normal(next(keys), (cfg.hidden_dim, D), std)

        gains_l.append(jnp.ones((1, 2 * D + qr + kvr), jnp.float32))   # g1|g2|qg|kvg
        wh1_l.append(jnp.concatenate([wcq, wckv, wk_rope], axis=1))    # fused x-proj
        wq_l.append(jnp.concatenate([wq_nope, wq_rope], axis=1))       # fused q proj
        wkv_l.append(jnp.concatenate([wk_nope, wv], axis=1))           # fused k_nope/v
        wo_l.append(wo)
        w1_l.append(w1)
        w2_l.append(w2)

    params['layers'] = {
        'gains': jnp.stack(gains_l).astype(jnp.float32),
        'wh1': jnp.stack(wh1_l).astype(jnp.bfloat16),
        'wq': jnp.stack(wq_l).astype(jnp.bfloat16),
        'wkv': jnp.stack(wkv_l).astype(jnp.bfloat16),
        'wo': jnp.stack(wo_l).astype(jnp.bfloat16),
        'w1': jnp.stack(w1_l).astype(jnp.bfloat16),
        'w2': jnp.stack(w2_l).astype(jnp.bfloat16),
    }
    return params


# ----------------------------------------------------------------------------
if __name__ == "__main__":
    cfg = Config()
    key = jax.random.PRNGKey(0)
    pkey, tkey = jax.random.split(key)
    params = init_params(cfg, pkey)

    batch, seq = 2, cfg.seq_len
    tokens = jax.random.randint(tkey, (batch, seq), 0, cfg.vocab_size, dtype=jnp.int32)

    logits = transformer_forward(tokens, params, cfg)
    logits = jax.block_until_ready(logits)

    assert logits.shape == (batch, seq, cfg.vocab_size), logits.shape
    assert bool(jnp.all(jnp.isfinite(logits)))
    # TODO(synk): dropout is a no-op here (p=0.0, inference semantics).
    print("KERNEL_OK")
</pallas_src>

<mosaic_0001>
module attributes {stable_mosaic.version = 11 : i64} {
  func.func @kernel(%arg0: i32, %arg1: i32, %arg2: memref<16x32xf32, #tpu.memory_space<vmem>>, %arg3: memref<16x16xf32, #tpu.memory_space<vmem>>, %arg4: memref<16x16xf32, #tpu.memory_space<vmem>>, %arg5: memref<16x16xf32, #tpu.memory_space<vmem>>, %arg6: memref<16x4xf32, #tpu.memory_space<vmem>>, %arg7: memref<16x4xf32, #tpu.memory_space<vmem>>, %arg8: memref<1x32xf32, #tpu.memory_space<vmem>>, %arg9: memref<32x128xbf16, #tpu.memory_space<vmem>>, %arg10: memref<1x1x96xf32, #tpu.memory_space<vmem>>, %arg11: memref<1x32x40xbf16, #tpu.memory_space<vmem>>, %arg12: memref<1x16x64xbf16, #tpu.memory_space<vmem>>, %arg13: memref<1x16x64xbf16, #tpu.memory_space<vmem>>, %arg14: memref<1x32x32xbf16, #tpu.memory_space<vmem>>, %arg15: memref<1x32x64xbf16, #tpu.memory_space<vmem>>, %arg16: memref<1x64x32xbf16, #tpu.memory_space<vmem>>, %arg17: memref<16x128xf32, #tpu.memory_space<vmem>>, %arg18: memref<16x32xf32, #tpu.memory_space<vmem>>) attributes {dimension_semantics = [#tpu.dimension_semantics<parallel>, #tpu.dimension_semantics<arbitrary>], iteration_bounds = array<i64: 1, 2>, scalar_prefetch = 0 : i64, scratch_operands = 1 : i64, tpu.core_type = #tpu.core_type<tc>, window_params = [{transform_indices = @transform_0, window_bounds = array<i64: 16, 32>}, {pipeline_mode = #tpu.pipeline_mode<synchronous>, transform_indices = @transform_1, window_bounds = array<i64: 16, 16>}, {pipeline_mode = #tpu.pipeline_mode<synchronous>, transform_indices = @transform_2, window_bounds = array<i64: 16, 16>}, {pipeline_mode = #tpu.pipeline_mode<synchronous>, transform_indices = @transform_3, window_bounds = array<i64: 16, 16>}, {pipeline_mode = #tpu.pipeline_mode<synchronous>, transform_indices = @transform_4, window_bounds = array<i64: 16, 4>}, {pipeline_mode = #tpu.pipeline_mode<synchronous>, transform_indices = @transform_5, window_bounds = array<i64: 16, 4>}, {pipeline_mode = #tpu.pipeline_mode<synchronous>, transform_indices = @transform_6, window_bounds = array<i64: 1, 32>}, {pipeline_mode = #tpu.pipeline_mode<synchronous>, transform_indices = @transform_7, window_bounds = array<i64: 32, 128>}, {transform_indices = @transform_8, window_bounds = array<i64: 1, 1, 96>}, {transform_indices = @transform_9, window_bounds = array<i64: 1, 32, 40>}, {transform_indices = @transform_10, window_bounds = array<i64: 1, 16, 64>}, {transform_indices = @transform_11, window_bounds = array<i64: 1, 16, 64>}, {transform_indices = @transform_12, window_bounds = array<i64: 1, 32, 32>}, {transform_indices = @transform_13, window_bounds = array<i64: 1, 32, 64>}, {transform_indices = @transform_14, window_bounds = array<i64: 1, 64, 32>}, {transform_indices = @transform_15, window_bounds = array<i64: 16, 128>}]} {
    %c0_i32 = arith.constant 0 : i32
    %0 = arith.cmpi eq, %arg1, %c0_i32 : i32
    %1 = arith.extui %0 : i1 to i32
    %c0_i32_0 = arith.constant 0 : i32
    %2 = arith.cmpi ne, %1, %c0_i32_0 : i32
    scf.if %2 {
      %c0_74 = arith.constant 0 : index
      %c0_75 = arith.constant 0 : index
      %220 = vector.load %arg2[%c0_74, %c0_75] : memref<16x32xf32, #tpu.memory_space<vmem>>, vector<16x32xf32>
      %c0_76 = arith.constant 0 : index
      %c0_77 = arith.constant 0 : index
      %221 = vector.load %arg18[%c0_76, %c0_77] : memref<16x32xf32, #tpu.memory_space<vmem>>, vector<16x32xf32>
      tpu.vector_store %arg18[%c0_76, %c0_77], %220 {strides = array<i32>} : memref<16x32xf32, #tpu.memory_space<vmem>>, vector<16x32xf32>,
    } else {
    }
    %c0 = arith.constant 0 : index
    %c0_1 = arith.constant 0 : index
    %3 = vector.load %arg18[%c0, %c0_1] : memref<16x32xf32, #tpu.memory_space<vmem>>, vector<16x32xf32>
    %c0_2 = arith.constant 0 : index
    %c0_3 = arith.constant 0 : index
    %c0_4 = arith.constant 0 : index
    %4 = vector.load %arg10[%c0_2, %c0_3, %c0_4] : memref<1x1x96xf32, #tpu.memory_space<vmem>>, vector<1x1x96xf32>
    %5 = vector.shape_cast %4 : vector<1x1x96xf32> to vector<1x96xf32>
    %6 = vector.extract_strided_slice %5 {offsets = [0, 0], sizes = [1, 32], strides = [1, 1]} : vector<1x96xf32> to vector<1x32xf32>
    %7 = vector.extract_strided_slice %5 {offsets = [0, 32], sizes = [1, 32], strides = [1, 1]} : vector<1x96xf32> to vector<1x32xf32>
    %8 = vector.extract_strided_slice %5 {offsets = [0, 64], sizes = [1, 16], strides = [1, 1]} : vector<1x96xf32> to vector<1x16xf32>
    %9 = vector.extract_strided_slice %5 {offsets = [0, 80], sizes = [1, 16], strides = [1, 1]} : vector<1x96xf32> to vector<1x16xf32>
    %10 = arith.mulf %3, %3 : vector<16x32xf32>
    %cst = arith.constant dense<0.000000e+00> : vector<16xf32>
    %11 = vector.multi_reduction <add>, %10, %cst [1] : vector<16x32xf32> to vector<16xf32>
    %12 = vector.shape_cast %11 : vector<16xf32> to vector<16x1xf32>
    %cst_5 = arith.constant 3.200000e+01 : f32
    %13 = vector.broadcast %cst_5 : f32 to vector<16x1xf32>
    %14 = arith.divf %12, %13 : vector<16x1xf32>
    %cst_6 = arith.constant 9.99999997E-7 : f32
    %15 = vector.broadcast %cst_6 : f32 to vector<16x1xf32>
    %16 = arith.addf %14, %15 : vector<16x1xf32>
    %17 = math.rsqrt %16 : vector<16x1xf32>
    %18 = vector.broadcast %17 : vector<16x1xf32> to vector<16x32xf32>
    %19 = arith.mulf %3, %18 : vector<16x32xf32>
    %20 = vector.broadcast %6 : vector<1x32xf32> to vector<16x32xf32>
    %21 = arith.mulf %19, %20 : vector<16x32xf32>
    %22 = arith.truncf %21 : vector<16x32xf32> to vector<16x32xbf16>
    %c0_7 = arith.constant 0 : index
    %c0_8 = arith.constant 0 : index
    %c0_9 = arith.constant 0 : index
    %23 = vector.load %arg11[%c0_7, %c0_8, %c0_9] : memref<1x32x40xbf16, #tpu.memory_space<vmem>>, vector<1x32x40xbf16>
    %24 = vector.shape_cast %23 : vector<1x32x40xbf16> to vector<32x40xbf16>
    %cst_10 = arith.constant dense<0.000000e+00> : vector<16x40xf32>
    %25 = tpu.matmul %22, %24, %cst_10 {dimension_numbers = #tpu.dot_dimension_numbers<[1], [0], [0], [1], [0, 0, 1, 1], [], []>} : vector<16x32xbf16>, vector<32x40xbf16>, vector<16x40xf32> -> vector<16x40xf32>
    %26 = vector.extract_strided_slice %25 {offsets = [0, 0], sizes = [16, 16], strides = [1, 1]} : vector<16x40xf32> to vector<16x16xf32>
    %27 = arith.mulf %26, %26 : vector<16x16xf32>
    %cst_11 = arith.constant dense<0.000000e+00> : vector<16xf32>
    %28 = vector.multi_reduction <add>, %27, %cst_11 [1] : vector<16x16xf32> to vector<16xf32>
    %29 = vector.shape_cast %28 : vector<16xf32> to vector<16x1xf32>
    %cst_12 = arith.constant 1.600000e+01 : f32
    %30 = vector.broadcast %cst_12 : f32 to vector<16x1xf32>
    %31 = arith.divf %29, %30 : vector<16x1xf32>
    %cst_13 = arith.constant 9.99999997E-7 : f32
    %32 = vector.broadcast %cst_13 : f32 to vector<16x1xf32>
    %33 = arith.addf %31, %32 : vector<16x1xf32>
    %34 = math.rsqrt %33 : vector<16x1xf32>
    %35 = vector.broadcast %34 : vector<16x1xf32> to vector<16x16xf32>
    %36 = arith.mulf %26, %35 : vector<16x16xf32>
    %37 = vector.broadcast %8 : vector<1x16xf32> to vector<16x16xf32>
    %38 = arith.mulf %36, %37 : vector<16x16xf32>
    %39 = vector.extract_strided_slice %25 {offsets = [0, 16], sizes = [16, 16], strides = [1, 1]} : vector<16x40xf32> to vector<16x16xf32>
    %40 = arith.mulf %39, %39 : vector<16x16xf32>
    %cst_14 = arith.constant dense<0.000000e+00> : vector<16xf32>
    %41 = vector.multi_reduction <add>, %40, %cst_14 [1] : vector<16x16xf32> to vector<16xf32>
    %42 = vector.shape_cast %41 : vector<16xf32> to vector<16x1xf32>
    %cst_15 = arith.constant 1.600000e+01 : f32
    %43 = vector.broadcast %cst_15 : f32 to vector<16x1xf32>
    %44 = arith.divf %42, %43 : vector<16x1xf32>
    %cst_16 = arith.constant 9.99999997E-7 : f32
    %45 = vector.broadcast %cst_16 : f32 to vector<16x1xf32>
    %46 = arith.addf %44, %45 : vector<16x1xf32>
    %47 = math.rsqrt %46 : vector<16x1xf32>
    %48 = vector.broadcast %47 : vector<16x1xf32> to vector<16x16xf32>
    %49 = arith.mulf %39, %48 : vector<16x16xf32>
    %50 = vector.broadcast %9 : vector<1x16xf32> to vector<16x16xf32>
    %51 = arith.mulf %49, %50 : vector<16x16xf32>
    %52 = vector.extract_strided_slice %25 {offsets = [0, 32], sizes = [16, 8], strides = [1, 1]} : vector<16x40xf32> to vector<16x8xf32>
    %53 = arith.truncf %38 : vector<16x16xf32> to vector<16x16xbf16>
    %c0_17 = arith.constant 0 : index
    %c0_18 = arith.constant 0 : index
    %c0_19 = arith.constant 0 : index
    %54 = vector.load %arg12[%c0_17, %c0_18, %c0_19] : memref<1x16x64xbf16, #tpu.memory_space<vmem>>, vector<1x16x64xbf16>
    %55 = vector.shape_cast %54 : vector<1x16x64xbf16> to vector<16x64xbf16>
    %cst_20 = arith.constant dense<0.000000e+00> : vector<16x64xf32>
    %56 = tpu.matmul %53, %55, %cst_20 {dimension_numbers = #tpu.dot_dimension_numbers<[1], [0], [0], [1], [0, 0, 1, 1], [], []>} : vector<16x16xbf16>, vector<16x64xbf16>, vector<16x64xf32> -> vector<16x64xf32>
    %57 = arith.truncf %51 : vector<16x16xf32> to vector<16x16xbf16>
    %c0_21 = arith.constant 0 : index
    %c0_22 = arith.constant 0 : index
    %c0_23 = arith.constant 0 : index
    %58 = vector.load %arg13[%c0_21, %c0_22, %c0_23] : memref<1x16x64xbf16, #tpu.memory_space<vmem>>, vector<1x16x64xbf16>
    %59 = vector.shape_cast %58 : vector<1x16x64xbf16> to vector<16x64xbf16>
    %cst_24 = arith.constant dense<0.000000e+00> : vector<16x64xf32>
    %60 = tpu.matmul %57, %59, %cst_24 {dimension_numbers = #tpu.dot_dimension_numbers<[1], [0], [0], [1], [0, 0, 1, 1], [], []>} : vector<16x16xbf16>, vector<16x64xbf16>, vector<16x64xf32> -> vector<16x64xf32>
    %c0_25 = arith.constant 0 : index
    %c0_26 = arith.constant 0 : index
    %61 = vector.load %arg4[%c0_25, %c0_26] : memref<16x16xf32, #tpu.memory_space<vmem>>, vector<16x16xf32>
    %c0_27 = arith.constant 0 : index
    %c0_28 = arith.constant 0 : index
    %62 = vector.load %arg5[%c0_27, %c0_28] : memref<16x16xf32, #tpu.memory_space<vmem>>, vector<16x16xf32>
    %c0_29 = arith.constant 0 : index
    %c0_30 = arith.constant 0 : index
    %63 = vector.load %arg6[%c0_29, %c0_30] : memref<16x4xf32, #tpu.memory_space<vmem>>, vector<16x4xf32>
    %c0_31 = arith.constant 0 : index
    %c0_32 = arith.constant 0 : index
    %64 = vector.load %arg7[%c0_31, %c0_32] : memref<16x4xf32, #tpu.memory_space<vmem>>, vector<16x4xf32>
    %65 = vector.extract_strided_slice %56 {offsets = [0, 0], sizes = [16, 32], strides = [1, 1]} : vector<16x64xf32> to vector<16x32xf32>
    %66 = vector.extract_strided_slice %56 {offsets = [0, 32], sizes = [16, 16], strides = [1, 1]} : vector<16x64xf32> to vector<16x16xf32>
    %67 = vector.extract_strided_slice %56 {offsets = [0, 48], sizes = [16, 16], strides = [1, 1]} : vector<16x64xf32> to vector<16x16xf32>
    %68 = arith.mulf %66, %61 : vector<16x16xf32>
    %69 = arith.mulf %67, %62 : vector<16x16xf32>
    %70 = arith.subf %68, %69 : vector<16x16xf32>
    %71 = arith.mulf %66, %62 : vector<16x16xf32>
    %72 = arith.mulf %67, %61 : vector<16x16xf32>
    %73 = arith.addf %71, %72 : vector<16x16xf32>
    %74 = vector.extract_strided_slice %60 {offsets = [0, 0], sizes = [16, 32], strides = [1, 1]} : vector<16x64xf32> to vector<16x32xf32>
    %75 = vector.extract_strided_slice %60 {offsets = [0, 32], sizes = [16, 32], strides = [1, 1]} : vector<16x64xf32> to vector<16x32xf32>
    %76 = arith.truncf %75 : vector<16x32xf32> to vector<16x32xbf16>
    %77 = vector.extract_strided_slice %52 {offsets = [0, 0], sizes = [16, 4], strides = [1, 1]} : vector<16x8xf32> to vector<16x4xf32>
    %78 = vector.extract_strided_slice %52 {offsets = [0, 4], sizes = [16, 4], strides = [1, 1]} : vector<16x8xf32> to vector<16x4xf32>
    %79 = arith.mulf %77, %63 : vector<16x4xf32>
    %80 = arith.mulf %78, %64 : vector<16x4xf32>
    %81 = arith.subf %79, %80 : vector<16x4xf32>
    %82 = arith.mulf %77, %64 : vector<16x4xf32>
    %83 = arith.mulf %78, %63 : vector<16x4xf32>
    %84 = arith.addf %82, %83 : vector<16x4xf32>
    %85 = tpu.concatenate %81, %84 in 1 : vector<16x4xf32>, vector<16x4xf32> -> vector<16x8xf32>
    %86 = vector.extract_strided_slice %65 {offsets = [0, 0], sizes = [16, 8], strides = [1, 1]} : vector<16x32xf32> to vector<16x8xf32>
    %87 = vector.extract_strided_slice %70 {offsets = [0, 0], sizes = [16, 4], strides = [1, 1]} : vector<16x16xf32> to vector<16x4xf32>
    %88 = vector.extract_strided_slice %73 {offsets = [0, 0], sizes = [16, 4], strides = [1, 1]} : vector<16x16xf32> to vector<16x4xf32>
    %89 = vector.extract_strided_slice %74 {offsets = [0, 0], sizes = [16, 8], strides = [1, 1]} : vector<16x32xf32> to vector<16x8xf32>
    %90 = vector.extract_strided_slice %65 {offsets = [0, 8], sizes = [16, 8], strides = [1, 1]} : vector<16x32xf32> to vector<16x8xf32>
    %91 = vector.extract_strided_slice %70 {offsets = [0, 4], sizes = [16, 4], strides = [1, 1]} : vector<16x16xf32> to vector<16x4xf32>
    %92 = vector.extract_strided_slice %73 {offsets = [0, 4], sizes = [16, 4], strides = [1, 1]} : vector<16x16xf32> to vector<16x4xf32>
    %93 = vector.extract_strided_slice %74 {offsets = [0, 8], sizes = [16, 8], strides = [1, 1]} : vector<16x32xf32> to vector<16x8xf32>
    %94 = vector.extract_strided_slice %65 {offsets = [0, 16], sizes = [16, 8], strides = [1, 1]} : vector<16x32xf32> to vector<16x8xf32>
    %95 = vector.extract_strided_slice %70 {offsets = [0, 8], sizes = [16, 4], strides = [1, 1]} : vector<16x16xf32> to vector<16x4xf32>
    %96 = vector.extract_strided_slice %73 {offsets = [0, 8], sizes = [16, 4], strides = [1, 1]} : vector<16x16xf32> to vector<16x4xf32>
    %97 = vector.extract_strided_slice %74 {offsets = [0, 16], sizes = [16, 8], strides = [1, 1]} : vector<16x32xf32> to vector<16x8xf32>
    %98 = vector.extract_strided_slice %65 {offsets = [0, 24], sizes = [16, 8], strides = [1, 1]} : vector<16x32xf32> to vector<16x8xf32>
    %99 = vector.extract_strided_slice %70 {offsets = [0, 12], sizes = [16, 4], strides = [1, 1]} : vector<16x16xf32> to vector<16x4xf32>
    %100 = vector.extract_strided_slice %73 {offsets = [0, 12], sizes = [16, 4], strides = [1, 1]} : vector<16x16xf32> to vector<16x4xf32>
    %101 = vector.extract_strided_slice %74 {offsets = [0, 24], sizes = [16, 8], strides = [1, 1]} : vector<16x32xf32> to vector<16x8xf32>
    %102 = tpu.concatenate %86, %87, %88, %90, %91, %92, %94, %95, %96, %98, %99, %100 in 1 : vector<16x8xf32>, vector<16x4xf32>, vector<16x4xf32>, vector<16x8xf32>, vector<16x4xf32>, vector<16x4xf32>, vector<16x8xf32>, vector<16x4xf32>, vector<16x4xf32>, vector<16x8xf32>, vector<16x4xf32>, vector<16x4xf32> -> vector<16x64xf32>
    %103 = arith.truncf %102 : vector<16x64xf32> to vector<16x64xbf16>
    %104 = tpu.concatenate %89, %85, %93, %85, %97, %85, %101, %85 in 1 : vector<16x8xf32>, vector<16x8xf32>, vector<16x8xf32>, vector<16x8xf32>, vector<16x8xf32>, vector<16x8xf32>, vector<16x8xf32>, vector<16x8xf32> -> vector<16x64xf32>
    %105 = arith.truncf %104 : vector<16x64xf32> to vector<16x64xbf16>
    %c0_33 = arith.constant 0 : index
    %c0_34 = arith.constant 0 : index
    %106 = vector.load %arg3[%c0_33, %c0_34] : memref<16x16xf32, #tpu.memory_space<vmem>>, vector<16x16xf32>
    %107 = vector.extract_strided_slice %103 {offsets = [0, 0], sizes = [16, 16], strides = [1, 1]} : vector<16x64xbf16> to vector<16x16xbf16>
    %108 = vector.extract_strided_slice %105 {offsets = [0, 0], sizes = [16, 16], strides = [1, 1]} : vector<16x64xbf16> to vector<16x16xbf16>
    %cst_35 = arith.constant dense<0.000000e+00> : vector<16x16xf32>
    %109 = tpu.matmul %107, %108, %cst_35 {dimension_numbers = #tpu.dot_dimension_numbers<[1], [1], [0], [0], [0, 0, 1, 0], [], []>} : vector<16x16xbf16>, vector<16x16xbf16>, vector<16x16xf32> -> vector<16x16xf32>
    %cst_36 = arith.constant 2.500000e-01 : f32
    %110 = vector.broadcast %cst_36 : f32 to vector<16x16xf32>
    %111 = arith.mulf %109, %110 : vector<16x16xf32>
    %112 = arith.addf %111, %106 : vector<16x16xf32>
    %cst_37 = arith.constant dense<0xFF800000> : vector<16xf32>
    %113 = vector.multi_reduction <maximumf>, %112, %cst_37 [1] : vector<16x16xf32> to vector<16xf32>
    %114 = vector.shape_cast %113 : vector<16xf32> to vector<16x1xf32>
    %115 = vector.broadcast %114 : vector<16x1xf32> to vector<16x16xf32>
    %116 = arith.subf %112, %115 : vector<16x16xf32>
    %117 = math.exp %116 : vector<16x16xf32>
    %cst_38 = arith.constant dense<0.000000e+00> : vector<16xf32>
    %118 = vector.multi_reduction <add>, %117, %cst_38 [1] : vector<16x16xf32> to vector<16xf32>
    %119 = vector.shape_cast %118 : vector<16xf32> to vector<16x1xf32>
    %120 = tpu.reciprocal %119 {approx = true} : vector<16x1xf32> -> vector<16x1xf32>
    %121 = vector.broadcast %120 : vector<16x1xf32> to vector<16x16xf32>
    %122 = arith.mulf %117, %121 : vector<16x16xf32>
    %123 = arith.truncf %122 : vector<16x16xf32> to vector<16x16xbf16>
    %124 = vector.extract_strided_slice %76 {offsets = [0, 0], sizes = [16, 8], strides = [1, 1]} : vector<16x32xbf16> to vector<16x8xbf16>
    %cst_39 = arith.constant dense<0.000000e+00> : vector<16x8xf32>
    %125 = tpu.matmul %123, %124, %cst_39 {dimension_numbers = #tpu.dot_dimension_numbers<[1], [0], [0], [1], [0, 0, 1, 1], [], []>} : vector<16x16xbf16>, vector<16x8xbf16>, vector<16x8xf32> -> vector<16x8xf32>
    %126 = vector.extract_strided_slice %103 {offsets = [0, 16], sizes = [16, 16], strides = [1, 1]} : vector<16x64xbf16> to vector<16x16xbf16>
    %127 = vector.extract_strided_slice %105 {offsets = [0, 16], sizes = [16, 16], strides = [1, 1]} : vector<16x64xbf16> to vector<16x16xbf16>
    %cst_40 = arith.constant dense<0.000000e+00> : vector<16x16xf32>
    %128 = tpu.matmul %126, %127, %cst_40 {dimension_numbers = #tpu.dot_dimension_numbers<[1], [1], [0], [0], [0, 0, 1, 0], [], []>} : vector<16x16xbf16>, vector<16x16xbf16>, vector<16x16xf32> -> vector<16x16xf32>
    %cst_41 = arith.constant 2.500000e-01 : f32
    %129 = vector.broadcast %cst_41 : f32 to vector<16x16xf32>
    %130 = arith.mulf %128, %129 : vector<16x16xf32>
    %131 = arith.addf %130, %106 : vector<16x16xf32>
    %cst_42 = arith.constant dense<0xFF800000> : vector<16xf32>
    %132 = vector.multi_reduction <maximumf>, %131, %cst_42 [1] : vector<16x16xf32> to vector<16xf32>
    %133 = vector.shape_cast %132 : vector<16xf32> to vector<16x1xf32>
    %134 = vector.broadcast %133 : vector<16x1xf32> to vector<16x16xf32>
    %135 = arith.subf %131, %134 : vector<16x16xf32>
    %136 = math.exp %135 : vector<16x16xf32>
    %cst_43 = arith.constant dense<0.000000e+00> : vector<16xf32>
    %137 = vector.multi_reduction <add>, %136, %cst_43 [1] : vector<16x16xf32> to vector<16xf32>
    %138 = vector.shape_cast %137 : vector<16xf32> to vector<16x1xf32>
    %139 = tpu.reciprocal %138 {approx = true} : vector<16x1xf32> -> vector<16x1xf32>
    %140 = vector.broadcast %139 : vector<16x1xf32> to vector<16x16xf32>
    %141 = arith.mulf %136, %140 : vector<16x16xf32>
    %142 = arith.truncf %141 : vector<16x16xf32> to vector<16x16xbf16>
    %143 = vector.extract_strided_slice %76 {offsets = [0, 8], sizes = [16, 8], strides = [1, 1]} : vector<16x32xbf16> to vector<16x8xbf16>
    %cst_44 = arith.constant dense<0.000000e+00> : vector<16x8xf32>
    %144 = tpu.matmul %142, %143, %cst_44 {dimension_numbers = #tpu.dot_dimension_numbers<[1], [0], [0], [1], [0, 0, 1, 1], [], []>} : vector<16x16xbf16>, vector<16x8xbf16>, vector<16x8xf32> -> vector<16x8xf32>
    %145 = vector.extract_strided_slice %103 {offsets = [0, 32], sizes = [16, 16], strides = [1, 1]} : vector<16x64xbf16> to vector<16x16xbf16>
    %146 = vector.extract_strided_slice %105 {offsets = [0, 32], sizes = [16, 16], strides = [1, 1]} : vector<16x64xbf16> to vector<16x16xbf16>
    %cst_45 = arith.constant dense<0.000000e+00> : vector<16x16xf32>
    %147 = tpu.matmul %145, %146, %cst_45 {dimension_numbers = #tpu.dot_dimension_numbers<[1], [1], [0], [0], [0, 0, 1, 0], [], []>} : vector<16x16xbf16>, vector<16x16xbf16>, vector<16x16xf32> -> vector<16x16xf32>
    %cst_46 = arith.constant 2.500000e-01 : f32
    %148 = vector.broadcast %cst_46 : f32 to vector<16x16xf32>
    %149 = arith.mulf %147, %148 : vector<16x16xf32>
    %150 = arith.addf %149, %106 : vector<16x16xf32>
    %cst_47 = arith.constant dense<0xFF800000> : vector<16xf32>
    %151 = vector.multi_reduction <maximumf>, %150, %cst_47 [1] : vector<16x16xf32> to vector<16xf32>
    %152 = vector.shape_cast %151 : vector<16xf32> to vector<16x1xf32>
    %153 = vector.broadcast %152 : vector<16x1xf32> to vector<16x16xf32>
    %154 = arith.subf %150, %153 : vector<16x16xf32>
    %155 = math.exp %154 : vector<16x16xf32>
    %cst_48 = arith.constant dense<0.000000e+00> : vector<16xf32>
    %156 = vector.multi_reduction <add>, %155, %cst_48 [1] : vector<16x16xf32> to vector<16xf32>
    %157 = vector.shape_cast %156 : vector<16xf32> to vector<16x1xf32>
    %158 = tpu.reciprocal %157 {approx = true} : vector<16x1xf32> -> vector<16x1xf32>
    %159 = vector.broadcast %158 : vector<16x1xf32> to vector<16x16xf32>
    %160 = arith.mulf %155, %159 : vector<16x16xf32>
    %161 = arith.truncf %160 : vector<16x16xf32> to vector<16x16xbf16>
    %162 = vector.extract_strided_slice %76 {offsets = [0, 16], sizes = [16, 8], strides = [1, 1]} : vector<16x32xbf16> to vector<16x8xbf16>
    %cst_49 = arith.constant dense<0.000000e+00> : vector<16x8xf32>
    %163 = tpu.matmul %161, %162, %cst_49 {dimension_numbers = #tpu.dot_dimension_numbers<[1], [0], [0], [1], [0, 0, 1, 1], [], []>} : vector<16x16xbf16>, vector<16x8xbf16>, vector<16x8xf32> -> vector<16x8xf32>
    %164 = vector.extract_strided_slice %103 {offsets = [0, 48], sizes = [16, 16], strides = [1, 1]} : vector<16x64xbf16> to vector<16x16xbf16>
    %165 = vector.extract_strided_slice %105 {offsets = [0, 48], sizes = [16, 16], strides = [1, 1]} : vector<16x64xbf16> to vector<16x16xbf16>
    %cst_50 = arith.constant dense<0.000000e+00> : vector<16x16xf32>
    %166 = tpu.matmul %164, %165, %cst_50 {dimension_numbers = #tpu.dot_dimension_numbers<[1], [1], [0], [0], [0, 0, 1, 0], [], []>} : vector<16x16xbf16>, vector<16x16xbf16>, vector<16x16xf32> -> vector<16x16xf32>
    %cst_51 = arith.constant 2.500000e-01 : f32
    %167 = vector.broadcast %cst_51 : f32 to vector<16x16xf32>
    %168 = arith.mulf %166, %167 : vector<16x16xf32>
    %169 = arith.addf %168, %106 : vector<16x16xf32>
    %cst_52 = arith.constant dense<0xFF800000> : vector<16xf32>
    %170 = vector.multi_reduction <maximumf>, %169, %cst_52 [1] : vector<16x16xf32> to vector<16xf32>
    %171 = vector.shape_cast %170 : vector<16xf32> to vector<16x1xf32>
    %172 = vector.broadcast %171 : vector<16x1xf32> to vector<16x16xf32>
    %173 = arith.subf %169, %172 : vector<16x16xf32>
    %174 = math.exp %173 : vector<16x16xf32>
    %cst_53 = arith.constant dense<0.000000e+00> : vector<16xf32>
    %175 = vector.multi_reduction <add>, %174, %cst_53 [1] : vector<16x16xf32> to vector<16xf32>
    %176 = vector.shape_cast %175 : vector<16xf32> to vector<16x1xf32>
    %177 = tpu.reciprocal %176 {approx = true} : vector<16x1xf32> -> vector<16x1xf32>
    %178 = vector.broadcast %177 : vector<16x1xf32> to vector<16x16xf32>
    %179 = arith.mulf %174, %178 : vector<16x16xf32>
    %180 = arith.truncf %179 : vector<16x16xf32> to vector<16x16xbf16>
    %181 = vector.extract_strided_slice %76 {offsets = [0, 24], sizes = [16, 8], strides = [1, 1]} : vector<16x32xbf16> to vector<16x8xbf16>
    %cst_54 = arith.constant dense<0.000000e+00> : vector<16x8xf32>
    %182 = tpu.matmul %180, %181, %cst_54 {dimension_numbers = #tpu.dot_dimension_numbers<[1], [0], [0], [1], [0, 0, 1, 1], [], []>} : vector<16x16xbf16>, vector<16x8xbf16>, vector<16x8xf32> -> vector<16x8xf32>
    %183 = tpu.concatenate %125, %144, %163, %182 in 1 : vector<16x8xf32>, vector<16x8xf32>, vector<16x8xf32>, vector<16x8xf32> -> vector<16x32xf32>
    %184 = arith.truncf %183 : vector<16x32xf32> to vector<16x32xbf16>
    %c0_55 = arith.constant 0 : index
    %c0_56 = arith.constant 0 : index
    %c0_57 = arith.constant 0 : index
    %185 = vector.load %arg14[%c0_55, %c0_56, %c0_57] : memref<1x32x32xbf16, #tpu.memory_space<vmem>>, vector<1x32x32xbf16>
    %186 = vector.shape_cast %185 : vector<1x32x32xbf16> to vector<32x32xbf16>
    %cst_58 = arith.constant dense<0.000000e+00> : vector<16x32xf32>
    %187 = tpu.matmul %184, %186, %cst_58 {dimension_numbers = #tpu.dot_dimension_numbers<[1], [0], [0], [1], [0, 0, 1, 1], [], []>} : vector<16x32xbf16>, vector<32x32xbf16>, vector<16x32xf32> -> vector<16x32xf32>
    %188 = arith.addf %3, %187 : vector<16x32xf32>
    %189 = arith.mulf %188, %188 : vector<16x32xf32>
    %cst_59 = arith.constant dense<0.000000e+00> : vector<16xf32>
    %190 = vector.multi_reduction <add>, %189, %cst_59 [1] : vector<16x32xf32> to vector<16xf32>
    %191 = vector.shape_cast %190 : vector<16xf32> to vector<16x1xf32>
    %cst_60 = arith.constant 3.200000e+01 : f32
    %192 = vector.broadcast %cst_60 : f32 to vector<16x1xf32>
    %193 = arith.divf %191, %192 : vector<16x1xf32>
    %cst_61 = arith.constant 9.99999997E-7 : f32
    %194 = vector.broadcast %cst_61 : f32 to vector<16x1xf32>
    %195 = arith.addf %193, %194 : vector<16x1xf32>
    %196 = math.rsqrt %195 : vector<16x1xf32>
    %197 = vector.broadcast %196 : vector<16x1xf32> to vector<16x32xf32>
    %198 = arith.mulf %188, %197 : vector<16x32xf32>
    %199 = vector.broadcast %7 : vector<1x32xf32> to vector<16x32xf32>
    %200 = arith.mulf %198, %199 : vector<16x32xf32>
    %201 = arith.truncf %200 : vector<16x32xf32> to vector<16x32xbf16>
    %c0_62 = arith.constant 0 : index
    %c0_63 = arith.constant 0 : index
    %c0_64 = arith.constant 0 : index
    %202 = vector.load %arg15[%c0_62, %c0_63, %c0_64] : memref<1x32x64xbf16, #tpu.memory_space<vmem>>, vector<1x32x64xbf16>
    %203 = vector.shape_cast %202 : vector<1x32x64xbf16> to vector<32x64xbf16>
    %cst_65 = arith.constant dense<0.000000e+00> : vector<16x64xf32>
    %204 = tpu.matmul %201, %203, %cst_65 {dimension_numbers = #tpu.dot_dimension_numbers<[1], [0], [0], [1], [0, 0, 1, 1], [], []>} : vector<16x32xbf16>, vector<32x64xbf16>, vector<16x64xf32> -> vector<16x64xf32>
    %205 = arith.negf %204 : vector<16x64xf32>
    %206 = math.exp %205 : vector<16x64xf32>
    %cst_66 = arith.constant 1.000000e+00 : f32
    %207 = vector.broadcast %cst_66 : f32 to vector<16x64xf32>
    %208 = arith.addf %207, %206 : vector<16x64xf32>
    %209 = arith.divf %207, %208 : vector<16x64xf32>
    %210 = arith.mulf %204, %209 : vector<16x64xf32>
    %211 = arith.truncf %210 : vector<16x64xf32> to vector<16x64xbf16>
    %c0_67 = arith.constant 0 : index
    %c0_68 = arith.constant 0 : index
    %c0_69 = arith.constant 0 : index
    %212 = vector.load %arg16[%c0_67, %c0_68, %c0_69] : memref<1x64x32xbf16, #tpu.memory_space<vmem>>, vector<1x64x32xbf16>
    %213 = vector.shape_cast %212 : vector<1x64x32xbf16> to vector<64x32xbf16>
    %cst_70 = arith.constant dense<0.000000e+00> : vector<16x32xf32>
    %214 = tpu.matmul %211, %213, %cst_70 {dimension_numbers = #tpu.dot_dimension_numbers<[1], [0], [0], [1], [0, 0, 1, 1], [], []>} : vector<16x64xbf16>, vector<64x32xbf16>, vector<16x32xf32> -> vector<16x32xf32>
    %215 = arith.addf %188, %214 : vector<16x32xf32>
    %c0_71 = arith.constant 0 : index
    %c0_72 = arith.constant 0 : index
    %216 = vector.load %arg18[%c0_71, %c0_72] : memref<16x32xf32, #tpu.memory_space<vmem>>, vector<16x32xf32>
    tpu.vector_store %arg18[%c0_71, %c0_72], %215 {strides = array<i32>} : memref<16x32xf32, #tpu.memory_space<vmem>>, vector<16x32xf32>,
    %c1_i32 = arith.constant 1 : i32
    %217 = arith.cmpi eq, %arg1, %c1_i32 : i32
    %218 = arith.extui %217 : i1 to i32
    %c0_i32_73 = arith.constant 0 : i32
    %219 = arith.cmpi ne, %218, %c0_i32_73 : i32
    scf.if %219 {
      %c0_74 = arith.constant 0 : index
      %c0_75 = arith.constant 0 : index
      %220 = vector.load %arg8[%c0_74, %c0_75] : memref<1x32xf32, #tpu.memory_space<vmem>>, vector<1x32xf32>
      %221 = arith.mulf %215, %215 : vector<16x32xf32>
      %cst_76 = arith.constant dense<0.000000e+00> : vector<16xf32>
      %222 = vector.multi_reduction <add>, %221, %cst_76 [1] : vector<16x32xf32> to vector<16xf32>
      %223 = vector.shape_cast %222 : vector<16xf32> to vector<16x1xf32>
      %cst_77 = arith.constant 3.200000e+01 : f32
      %224 = vector.broadcast %cst_77 : f32 to vector<16x1xf32>
      %225 = arith.divf %223, %224 : vector<16x1xf32>
      %cst_78 = arith.constant 9.99999997E-7 : f32
      %226 = vector.broadcast %cst_78 : f32 to vector<16x1xf32>
      %227 = arith.addf %225, %226 : vector<16x1xf32>
      %228 = math.rsqrt %227 : vector<16x1xf32>
      %229 = vector.broadcast %228 : vector<16x1xf32> to vector<16x32xf32>
      %230 = arith.mulf %215, %229 : vector<16x32xf32>
      %231 = vector.broadcast %220 : vector<1x32xf32> to vector<16x32xf32>
      %232 = arith.mulf %230, %231 : vector<16x32xf32>
      %233 = arith.truncf %232 : vector<16x32xf32> to vector<16x32xbf16>
      %c0_79 = arith.constant 0 : index
      %c0_80 = arith.constant 0 : index
      %234 = vector.load %arg9[%c0_79, %c0_80] : memref<32x128xbf16, #tpu.memory_space<vmem>>, vector<32x128xbf16>
      %cst_81 = arith.constant dense<0.000000e+00> : vector<16x128xf32>
      %235 = tpu.matmul %233, %234, %cst_81 {dimension_numbers = #tpu.dot_dimension_numbers<[1], [0], [0], [1], [0, 0, 1, 1], [], []>} : vector<16x32xbf16>, vector<32x128xbf16>, vector<16x128xf32> -> vector<16x128xf32>
      %c0_82 = arith.constant 0 : index
      %c0_83 = arith.constant 0 : index
      %236 = vector.load %arg17[%c0_82, %c0_83] : memref<16x128xf32, #tpu.memory_space<vmem>>, vector<16x128xf32>
      tpu.vector_store %arg17[%c0_82, %c0_83], %235 {strides = array<i32>} : memref<16x128xf32, #tpu.memory_space<vmem>>, vector<16x128xf32>,
    } else {
    }
    return
  }
  func.func @transform_0(%arg0: i32, %arg1: i32) -> (i32, i32) {
    %c0_i32 = arith.constant 0 : i32
    %c0_i32_0 = arith.constant 0 : i32
    return %arg0, %c0_i32 : i32, i32
  }
  func.func @transform_1(%arg0: i32, %arg1: i32) -> (i32, i32) {
    %c0_i32 = arith.constant 0 : i32
    %c0_i32_0 = arith.constant 0 : i32
    %c0_i32_1 = arith.constant 0 : i32
    return %c0_i32, %c0_i32_0 : i32, i32
  }
  func.func @transform_2(%arg0: i32, %arg1: i32) -> (i32, i32) {
    %c0_i32 = arith.constant 0 : i32
    %c0_i32_0 = arith.constant 0 : i32
    %c0_i32_1 = arith.constant 0 : i32
    return %c0_i32, %c0_i32_0 : i32, i32
  }
  func.func @transform_3(%arg0: i32, %arg1: i32) -> (i32, i32) {
    %c0_i32 = arith.constant 0 : i32
    %c0_i32_0 = arith.constant 0 : i32
    %c0_i32_1 = arith.constant 0 : i32
    return %c0_i32, %c0_i32_0 : i32, i32
  }
  func.func @transform_4(%arg0: i32, %arg1: i32) -> (i32, i32) {
    %c0_i32 = arith.constant 0 : i32
    %c0_i32_0 = arith.constant 0 : i32
    %c0_i32_1 = arith.constant 0 : i32
    return %c0_i32, %c0_i32_0 : i32, i32
  }
  func.func @transform_5(%arg0: i32, %arg1: i32) -> (i32, i32) {
    %c0_i32 = arith.constant 0 : i32
    %c0_i32_0 = arith.constant 0 : i32
    %c0_i32_1 = arith.constant 0 : i32
    return %c0_i32, %c0_i32_0 : i32, i32
  }
  func.func @transform_6(%arg0: i32, %arg1: i32) -> (i32, i32) {
    %c0_i32 = arith.constant 0 : i32
    %c0_i32_0 = arith.constant 0 : i32
    %c0_i32_1 = arith.constant 0 : i32
    return %c0_i32, %c0_i32_0 : i32, i32
  }
  func.func @transform_7(%arg0: i32, %arg1: i32) -> (i32, i32) {
    %c0_i32 = arith.constant 0 : i32
    %c0_i32_0 = arith.constant 0 : i32
    %c0_i32_1 = arith.constant 0 : i32
    return %c0_i32, %c0_i32_0 : i32, i32
  }
  func.func @transform_8(%arg0: i32, %arg1: i32) -> (i32, i32, i32) {
    %c0_i32 = arith.constant 0 : i32
    %c0_i32_0 = arith.constant 0 : i32
    %c0_i32_1 = arith.constant 0 : i32
    return %arg1, %c0_i32, %c0_i32_0 : i32, i32, i32
  }
  func.func @transform_9(%arg0: i32, %arg1: i32) -> (i32, i32, i32) {
    %c0_i32 = arith.constant 0 : i32
    %c0_i32_0 = arith.constant 0 : i32
    %c0_i32_1 = arith.constant 0 : i32
    return %arg1, %c0_i32, %c0_i32_0 : i32, i32, i32
  }
  func.func @transform_10(%arg0: i32, %arg1: i32) -> (i32, i32, i32) {
    %c0_i32 = arith.constant 0 : i32
    %c0_i32_0 = arith.constant 0 : i32
    %c0_i32_1 = arith.constant 0 : i32
    return %arg1, %c0_i32, %c0_i32_0 : i32, i32, i32
  }
  func.func @transform_11(%arg0: i32, %arg1: i32) -> (i32, i32, i32) {
    %c0_i32 = arith.constant 0 : i32
    %c0_i32_0 = arith.constant 0 : i32
    %c0_i32_1 = arith.constant 0 : i32
    return %arg1, %c0_i32, %c0_i32_0 : i32, i32, i32
  }
  func.func @transform_12(%arg0: i32, %arg1: i32) -> (i32, i32, i32) {
    %c0_i32 = arith.constant 0 : i32
    %c0_i32_0 = arith.constant 0 : i32
    %c0_i32_1 = arith.constant 0 : i32
    return %arg1, %c0_i32, %c0_i32_0 : i32, i32, i32
  }
  func.func @transform_13(%arg0: i32, %arg1: i32) -> (i32, i32, i32) {
    %c0_i32 = arith.constant 0 : i32
    %c0_i32_0 = arith.constant 0 : i32
    %c0_i32_1 = arith.constant 0 : i32
    return %arg1, %c0_i32, %c0_i32_0 : i32, i32, i32
  }
  func.func @transform_14(%arg0: i32, %arg1: i32) -> (i32, i32, i32) {
    %c0_i32 = arith.constant 0 : i32
    %c0_i32_0 = arith.constant 0 : i32
    %c0_i32_1 = arith.constant 0 : i32
    return %arg1, %c0_i32, %c0_i32_0 : i32, i32, i32
  }
  func.func @transform_15(%arg0: i32, %arg1: i32) -> (i32, i32) {
    %c0_i32 = arith.constant 0 : i32
    %c0_i32_0 = arith.constant 0 : i32
    return %arg0, %c0_i32 : i32, i32
  }
}

</mosaic_0001>

<bundles_post_ra>
// kernel: tpu_custom_call.1
= control target key start
LH: loop header
LB: loop body
LE: loop exit
PB: predicated region body
PF: predicated region fallthrough
CT: control target
= control target key end

     0   :  { %s4709_s0 = inlined_call_operand.hbm [shape: f32[16,32], index: 0, kind: input, shape index: {}]   ;;  %s4710_s1 = inlined_call_operand.hbm [shape: f32[16,16], index: 1, kind: input, shape index: {}]   ;;  %s4711_s2 = inlined_call_operand.hbm [shape: f32[16,16], index: 2, kind: input, shape index: {}]   ;;  %s4712_s3 = inlined_call_operand.hbm [shape: f32[16,16], index: 3, kind: input, shape index: {}]   ;;  %s4713_s4 = inlined_call_operand.hbm [shape: f32[16,4], index: 4, kind: input, shape index: {}]   ;;  %s4714_s5 = inlined_call_operand.hbm [shape: f32[16,4], index: 5, kind: input, shape index: {}]   ;;  %s4715_s6 = inlined_call_operand.hbm [shape: f32[1,32], index: 6, kind: input, shape index: {}]   ;;  %s4716_s7 = inlined_call_operand.hbm [shape: bf16[32,128], index: 7, kind: input, shape index: {}]   ;;  %s4717_s8 = inlined_call_operand.hbm [shape: f32[2,1,96], index: 8, kind: input, shape index: {}]   ;;  %s4718_s9 = inlined_call_operand.hbm [shape: bf16[2,32,40], index: 9, kind: input, shape index: {}]   ;;  %s4719_s10 = inlined_call_operand.hbm [shape: bf16[2,16,64], index: 10, kind: input, shape index: {}]   ;;  %s4720_s11 = inlined_call_operand.hbm [shape: bf16[2,16,64], index: 11, kind: input, shape index: {}]   ;;  %s4721_s12 = inlined_call_operand.hbm [shape: bf16[2,32,32], index: 12, kind: input, shape index: {}]   ;;  %s4722_s13 = inlined_call_operand.hbm [shape: bf16[2,32,64], index: 13, kind: input, shape index: {}]   ;;  %s4723_s14 = inlined_call_operand.hbm [shape: bf16[2,64,32], index: 14, kind: input, shape index: {}]   ;;  %s4724_s15 = inlined_call_operand.hbm [shape: f32[16,128], index: 15, kind: output, shape index: {}]  }
   0x1   :  { %4761 = sst [smem:[#allocation42_spill]] %s4709_s0 }
   0x2   :  { %4762 = sst [smem:[#allocation43_spill]] %s4715_s6 }
   0x3   :  { %4763 = sst [smem:[#allocation44_spill]] %s4716_s7 }
   0x4   :  { %4764 = sst [smem:[#allocation45_spill]] %s4717_s8 }
   0x5   :  { %4765 = sst [smem:[#allocation46_spill]] %s4718_s9 }
   0x6   :  { %4766 = sst [smem:[#allocation47_spill]] %s4719_s10 }
   0x7   :  { %4767 = sst [smem:[#allocation48_spill]] %s4720_s11 }
   0x8   :  { %4768 = sst [smem:[#allocation49_spill]] %s4721_s12 }
   0x9   :  { %4769 = sst [smem:[#allocation50_spill]] %s4723_s14 }
   0xa   :  { %4770 = sst [smem:[#allocation51_spill]] %s4724_s15 }
   0xb   :  { %20 = vsyncpa [#allocation4], 0 }
   0xc   :  { %21 = vsyncpa [#allocation7], 0 }
   0xd   :  { %22 = vsyncpa [#allocation10], 0 }
   0xe   :  { %23 = vsyncpa [#allocation13], 0 }
   0xf   :  { %24 = vsyncpa [#allocation16], 0 }
  0x10   :  { %25 = vsyncpa [#allocation5], 0  ;;  %s3828_s18 = smov 0   ;;  %s3830_s19 = smov 0  }
  0x11   :  { %s3832_s20 = smov 0   ;;  %s3834_s21 = smov 0  }
  0x12   :  { %s3836_s22 = smov 0   ;;  %s3838_s23 = smov 0  }
  0x13 LB: > { %4771 = sst [smem:[#allocation32_spill]] %s3683_s19  ;;  %s3859_s24 = sadd.s32 4294967295, %s3699_s23   ;;  %s3699_s23 = sphi %s3838_s23, %s31_s23   ;;  %s3695_s22 = sphi %s3836_s22, %s4836_s22   ;;  %s3691_s21 = sphi %s3834_s21, %s4835_s21   ;;  %s3687_s20 = sphi %s3832_s20, %s4834_s20   ;;  %s3683_s19 = sphi %s3830_s19, %s4833_s19   ;;  %s3679_s18 = sphi %s3828_s18, %s4832_s18  }
  0x14   : > { %4772 = sst [smem:[#allocation33_spill]] %s3687_s20  ;;  %p2544_p0 = scmp.ge.s32.totalorder %s3699_s23, 1 }
  0x15   : > { %4773 = sst [smem:[#allocation34_spill]] %s3691_s21  ;;  %p4727_p1 = scmp.eq.s32.totalorder %s3859_s24, 0 }
  0x16   : > { %4774 = sst [smem:[#allocation35_spill]] %s3695_s22  ;;  %p429_p2 = scmp.lt.s32.totalorder %s3699_s23, 3 }
  0x17   : > { %4775 = sst [smem:[#allocation36_spill]] %s3699_s23  ;;  %s3701_s26 = smov [#allocation3]  }
  0x18   : > { %4776 = sst [smem:[#allocation37_spill]] %s3859_s24  ;;  %p3864_p3 = pnand %p2544_p0, %p429_p2 }
  0x19   : > { %s444_s27 = sshll.u32 %s3701_s26, 4  ;;  %s4780_s0 = sld [smem:[#allocation42_spill]]  ;;  %s445_s27 = int_to_ptr.vmem [resolvable:$true] %s444_s27 }
  0x1a   : > { %s4777_s25 = scalar_select %p3864_p3, 1, 0 }
  0x1b   : > { %p2824_p4 = pneg %p3864_p3 }
  0x1c   : > { %4778 = sst [smem:[#allocation38_spill]] %s4777_s25 }
  0x1d   : > { %p3872_p5 = pnand %p2824_p4, %p4727_p1 }
  0x1f   : > { %s4779_s28 = scalar_select %p3872_p5, 1, 0 }
  0x20   : > { %s3165_s16 = scalar_lea.hbm %s4780_s0, 256  ;;  %p3884_p7 = pneg %p3872_p5 }
  0x21   : > { %p3166_p6 = scmp.ne.s32.totalorder %s4780_s0, %s3165_s16  ;;  %p3172_p10 = scmp.lt.u32.totalorder %s3165_s16, %s4780_s0 }
  0x22   : > { %s4781_s26 = scalar_select %p3884_p7, 1, 0 }
  0x23   : > { %p3168_p8 = pnand %p3884_p7, %p3166_p6 }
  0x25   : > { %p3169_p9 = pneg %p3168_p8 }
  0x27   : > { %p3174_p11 = pnand %p3172_p10, %p3169_p9 }
  0x29   : > { %3177 = shalt.err (!%p3174_p11)
}
  0x2a   : > { %s3178_s29 = scalar_lea.vmem %s445_s27, 256  ;;  %p3186_p2 = scmp.lt.s32.totalorder %s445_s27, %s445_s27 }
  0x2b   : > { %p3179_p12 = scmp.ne.s32.totalorder %s445_s27, %s3178_s29  ;;  %p3187_p4 = scmp.lt.s32.totalorder %s3178_s29, %s3178_s29 }
  0x2d   : > { %p3181_p13 = pnand %p3179_p12, %p3884_p7  ;;  %p3188_p1 = por %p3187_p4, %p3186_p2 }
  0x2f   : > { %p3182_p0 = pneg %p3181_p13 }
  0x31   : > { %p3189_p3 = pnand %p3188_p1, %p3182_p0 }
  0x33   : > { %3192 = shalt.err (!%p3189_p3)
}
  0x34   : > { %s4730_s15 = smov 128   ;;  %s4732_s21 = smov 8  }
  0x35   : > { %2827 = dma.hbm_to_vmem [thread:$0]  (!%p3872_p5), %s4780_s0, 256, %s445_s27, [#allocation4], %s4730_s15, %s4730_s15, %s4732_s21  }
  0x36   : > { %s40_s16 = sadd.s32 1, %s3695_s22  ;;  %s223_s17 = sadd.s32 1, %s3687_s20 }
  0x37   : > { %p41_p1 = scmp.ge.s32.totalorder %s40_s16, 2  ;;  %p230_p3 = scmp.ne.s32.totalorder %s3687_s20, %s3683_s19 }
  0x38   : > { %p231_p6 = scmp.eq.s32.totalorder %s3699_s23, 0  ;;  %p236_p9 = scmp.ne.s32.totalorder %s3683_s19, %s3679_s18 }
  0x39   : > { %s4838_s16 = smov (%p41_p1, %s40_s16), 0  ;;  %p2879_p10 = scmp.lt.s32.totalorder %s3699_s23, 2 }
  0x3a   : > { %4782 = sst [smem:[#allocation39_spill]] %s4838_s16  ;;  %p3910_p8 = por %p231_p6, %p230_p3 }
  0x3b   : > { %s220_s14 = ssub.s32 %s3695_s22, %s4838_s16  ;;  %p4784_p12 = scmp.eq.s32.totalorder %s3859_s24, 0 }
  0x3c   : > { %p221_p11 = scmp.eq.s32.totalorder %s220_s14, 0  ;;  %s547_s25 = sand.u32 1, %s3699_s23  }
  0x3d   : > { %p3921_p13 = por %p4784_p12, %p236_p9  ;;  %s3927_s30 = sand.u32 1, %s3687_s20  }
  0x3e   : > { %s3930_s15 = scalar_select %p221_p11, %s3687_s20, %s223_s17  }
  0x3f   : > { %s4785_s27 = scalar_select %p3921_p13, 1, 0 }
  0x40   : > { %4787 = sst [smem:[#allocation41_spill]] %s3930_s15  ;;  %s2554_s21 = sshll.u32 %s3695_s22, 4 }
  0x41   : > { %4786 = sst [smem:[#allocation40_spill]] %s4785_s27  ;;  %s550_s0 = scalar_lea.vmem [#allocation17], %s3927_s30 }
  0x42   : > { %s557_s7 = sshll.u32 %s550_s0, 4  ;;  %s4788_s8 = sld [smem:[#allocation45_spill]]  ;;  %s3939_s7 = int_to_ptr.vmem [resolvable:$true] %s557_s7 }
  0x43   : > { %p3943_p0 = pnand %p2879_p10, %p3910_p8  ;;  %s3948_s17 = sshll.u32 %s3927_s30, 4 }
  0x44   : > { %s3950_s0 = scalar_lea.sflag [#allocation4], %s547_s25 }
  0x45   : > { %s4789_s14 = scalar_select %p3943_p0, 1, 0 }
  0x46   : > { %p3956_p4 = pneg %p3943_p0 }
  0x48   : > { %s3937_s16 = scalar_lea.hbm %s4788_s8, %s2554_s21  ;;  %s3198_s18 = scalar_lea.hbm %s4788_s8, 32 }
  0x49   : > { %s3193_s15 = scalar_lea.hbm %s3937_s16, 16  ;;  %p3199_p6 = scmp.lt.u32.totalorder %s3937_s16, %s4788_s8 }
  0x4a   : > { %p3194_p2 = scmp.ne.s32.totalorder %s3937_s16, %s3193_s15  ;;  %p3200_p8 = scmp.lt.u32.totalorder %s3198_s18, %s3193_s15 }
  0x4b   : > { %s4790_s6 = scalar_select %p3956_p4, 1, 0 }
  0x4c   : > { %p3196_p1 = pnand %p3956_p4, %p3194_p2  ;;  %p3201_p9 = por %p3200_p8, %p3199_p6 }
  0x4d   : > { %p3202_p10 = scmp.lt.u32.totalorder %s3193_s15, %s3937_s16 }
  0x4e   : > { %p3197_p3 = pneg %p3196_p1 }
  0x4f   : > { %p3203_p11 = por %p3202_p10, %p3201_p9 }
  0x51   : > { %p3204_p12 = pnand %p3203_p11, %p3197_p3 }
  0x53   : > { %3207 = shalt.err (!%p3204_p12)
}
  0x54   : > { %s3208_s25 = scalar_lea.vmem %s3939_s7, 16  ;;  %s3704_s21 = smov [#allocation17]  }
  0x55   : > { %p3209_p2 = scmp.ne.s32.totalorder %s3939_s7, %s3208_s25  ;;  %s3213_s29 = sshll.u32 %s3704_s21, 4  ;;  %s3214_s29 = int_to_ptr.vmem [resolvable:$false] %s3213_s29 }
  0x56   : > { %s3215_s20 = scalar_lea.vmem %s3214_s29, 32  ;;  %p3216_p5 = scmp.lt.s32.totalorder %s3939_s7, %s3214_s29 }
  0x57   : > { %p3211_p1 = pnand %p3209_p2, %p3956_p4  ;;  %p3217_p7 = scmp.lt.s32.totalorder %s3215_s20, %s3208_s25 }
  0x59   : > { %p3212_p13 = pneg %p3211_p1  ;;  %p3218_p6 = por %p3217_p7, %p3216_p5 }
  0x5b   : > { %p3219_p8 = pnand %p3218_p6, %p3212_p13 }
  0x5d   : > { %3222 = shalt.err (!%p3219_p8)
}
  0x5e   : > { %2852 = dma.hbm_to_vmem [thread:$0]  (!%p3943_p0), %s3937_s16, 16, %s3939_s7, %s3950_s0  }
  0x5f   : > { %s3981_s23 = sshll.u32 %s3695_s22, 8  ;;  %s568_s15 = scalar_lea.vmem [#allocation18], %s3948_s17 }
  0x60   : > { %s575_s18 = sshll.u32 %s568_s15, 4  ;;  %s4791_s9 = sld [smem:[#allocation46_spill]]  ;;  %s3990_s18 = int_to_ptr.vmem [resolvable:$true] %s575_s18 }
  0x66   : > { %s3988_s25 = scalar_lea.hbm %s4791_s9, %s3981_s23  ;;  %s3228_s15 = scalar_lea.hbm %s4791_s9, 512 }
  0x67   : > { %s3223_s20 = scalar_lea.hbm %s3988_s25, 256  ;;  %p3229_p3 = scmp.lt.u32.totalorder %s3988_s25, %s4791_s9 }
  0x68   : > { %p3224_p5 = scmp.ne.s32.totalorder %s3988_s25, %s3223_s20  ;;  %p3230_p9 = scmp.lt.u32.totalorder %s3228_s15, %s3223_s20 }
  0x69   : > { %p3232_p11 = scmp.lt.u32.totalorder %s3223_s20, %s3988_s25 }
  0x6a   : > { %p3226_p7 = pnand %p3224_p5, %p3956_p4  ;;  %p3231_p10 = por %p3230_p9, %p3229_p3 }
  0x6c   : > { %p3227_p13 = pneg %p3226_p7  ;;  %p3233_p12 = por %p3232_p11, %p3231_p10 }
  0x6e   : > { %p3234_p2 = pnand %p3233_p12, %p3227_p13 }
  0x70   : > { %3237 = shalt.err (!%p3234_p2)
}
  0x71   : > { %s3238_s21 = scalar_lea.vmem %s3990_s18, 256  ;;  %s3705_s29 = smov [#allocation18]  }
  0x72   : > { %p3239_p1 = scmp.ne.s32.totalorder %s3990_s18, %s3238_s21  ;;  %s3243_s7 = sshll.u32 %s3705_s29, 4  ;;  %s3244_s7 = int_to_ptr.vmem [resolvable:$false] %s3243_s7 }
  0x73   : > { %s3245_s8 = scalar_lea.vmem %s3244_s7, 512  ;;  %p3246_p5 = scmp.lt.s32.totalorder %s3990_s18, %s3244_s7 }
  0x74   : > { %p3241_p6 = pnand %p3239_p1, %p3956_p4  ;;  %p3247_p7 = scmp.lt.s32.totalorder %s3245_s8, %s3238_s21 }
  0x76   : > { %p3242_p8 = pneg %p3241_p6  ;;  %p3248_p3 = por %p3247_p7, %p3246_p5 }
  0x78   : > { %p3249_p9 = pnand %p3248_p3, %p3242_p8 }
  0x7a   : > { %3252 = shalt.err (!%p3249_p9)
}
  0x7b   : > { %s4750_s27 = smov 64   ;;  %s4752_s20 = smov 4  }
  0x7c   : > { %2855 = dma.hbm_to_vmem [thread:$0]  (!%p3943_p0), %s3988_s25, 256, %s3990_s18, %s3950_s0, %s4750_s27, %s4750_s27, %s4752_s20  }
  0x7d   : > { %s2558_s16 = sshll.u32 %s3927_s30, 3  ;;  %s2628_s15 = sshll.u32 %s3695_s22, 7 }
  0x7e   : > { %s4792_s10 = sld [smem:[#allocation47_spill]]  ;;  %s589_s8 = scalar_lea.vmem [#allocation19], %s2558_s16 }
  0x7f   : > { %s596_s9 = sshll.u32 %s589_s8, 4  ;;  %s4793_s11 = sld [smem:[#allocation48_spill]]  ;;  %s4026_s9 = int_to_ptr.vmem [resolvable:$true] %s596_s9 }
  0x84   : > { %s4022_s7 = scalar_lea.hbm %s4792_s10, %s2628_s15  ;;  %s3258_s27 = scalar_lea.hbm %s4792_s10, 256 }
  0x85   : > { %s4031_s18 = scalar_lea.hbm %s4793_s11, %s2628_s15  ;;  %s3253_s25 = scalar_lea.hbm %s4022_s7, 128 }
  0x86   : > { %p3254_p13 = scmp.ne.s32.totalorder %s4022_s7, %s3253_s25  ;;  %p3259_p12 = scmp.lt.u32.totalorder %s4022_s7, %s4792_s10 }
  0x87   : > { %p3260_p2 = scmp.lt.u32.totalorder %s3258_s27, %s3253_s25  ;;  %p3262_p6 = scmp.lt.u32.totalorder %s3253_s25, %s4022_s7 }
  0x88   : > { %p3256_p10 = pnand %p3254_p13, %p3956_p4 }
  0x89   : > { %p3261_p1 = por %p3260_p2, %p3259_p12 }
  0x8a   : > { %p3257_p11 = pneg %p3256_p10 }
  0x8b   : > { %p3263_p8 = por %p3262_p6, %p3261_p1 }
  0x8d   : > { %p3264_p5 = pnand %p3263_p8, %p3257_p11 }
  0x8f   : > { %3267 = shalt.err (!%p3264_p5)
}
  0x90   : > { %s3268_s19 = scalar_lea.vmem %s4026_s9, 128  ;;  %s3708_s24 = smov [#allocation19]  }
  0x91   : > { %p3269_p7 = scmp.ne.s32.totalorder %s4026_s9, %s3268_s19  ;;  %s3273_s15 = sshll.u32 %s3708_s24, 4  ;;  %s3274_s15 = int_to_ptr.vmem [resolvable:$false] %s3273_s15 }
  0x92   : > { %s3275_s22 = scalar_lea.vmem %s3274_s15, 256  ;;  %p3276_p13 = scmp.lt.s32.totalorder %s4026_s9, %s3274_s15 }
  0x93   : > { %p3271_p3 = pnand %p3269_p7, %p3956_p4  ;;  %p3277_p10 = scmp.lt.s32.totalorder %s3275_s22, %s3268_s19 }
  0x95   : > { %p3272_p9 = pneg %p3271_p3  ;;  %p3278_p12 = por %p3277_p10, %p3276_p13 }
  0x97   : > { %p3279_p2 = pnand %p3278_p12, %p3272_p9 }
  0x99   : > { %3282 = shalt.err (!%p3279_p2)
}
  0x9a   : > { %s4794_s27 = smov 4   ;;  %s4795_s20 = smov 64  }
  0x9b   : > { %2858 = dma.hbm_to_vmem [thread:$0]  (!%p3943_p0), %s4022_s7, 128, %s4026_s9, %s3950_s0, %s4795_s20, %s4795_s20, %s4794_s27  }
  0x9c   : > { %s610_s8 = scalar_lea.vmem [#allocation20], %s2558_s16  ;;  %s4796_s12 = sld [smem:[#allocation49_spill]] }
  0x9d   : > { %s617_s25 = sshll.u32 %s610_s8, 4  ;;  %s3283_s24 = scalar_lea.hbm %s4031_s18, 128  ;;  %s4060_s25 = int_to_ptr.vmem [resolvable:$true] %s617_s25 }
  0x9e   : > { %p3284_p11 = scmp.ne.s32.totalorder %s4031_s18, %s3283_s24  ;;  %s3288_s10 = scalar_lea.hbm %s4793_s11, 256 }
  0x9f   : > { %p3289_p8 = scmp.lt.u32.totalorder %s4031_s18, %s4793_s11  ;;  %p3290_p5 = scmp.lt.u32.totalorder %s3288_s10, %s3283_s24 }
  0xa0   : > { %p3286_p1 = pnand %p3284_p11, %p3956_p4  ;;  %p3292_p3 = scmp.lt.u32.totalorder %s3283_s24, %s4031_s18 }
  0xa1   : > { %p3291_p7 = por %p3290_p5, %p3289_p8 }
  0xa2   : > { %s4066_s19 = scalar_lea.hbm %s4796_s12, %s3981_s23  ;;  %p3287_p6 = pneg %p3286_p1 }
  0xa3   : > { %p3293_p9 = por %p3292_p3, %p3291_p7 }
  0xa5   : > { %p3294_p13 = pnand %p3293_p9, %p3287_p6 }
  0xa7   : > { %3297 = shalt.err (!%p3294_p13)
}
  0xa8   : > { %s3298_s16 = scalar_lea.vmem %s4060_s25, 128  ;;  %s3709_s8 = smov [#allocation20]  }
  0xa9   : > { %p3299_p10 = scmp.ne.s32.totalorder %s4060_s25, %s3298_s16  ;;  %s3303_s21 = sshll.u32 %s3709_s8, 4  ;;  %s3304_s21 = int_to_ptr.vmem [resolvable:$false] %s3303_s21 }
  0xaa   : > { %s3305_s29 = scalar_lea.vmem %s3304_s21, 256  ;;  %p3306_p11 = scmp.lt.s32.totalorder %s4060_s25, %s3304_s21 }
  0xab   : > { %p3301_p12 = pnand %p3299_p10, %p3956_p4  ;;  %p3307_p1 = scmp.lt.s32.totalorder %s3305_s29, %s3298_s16 }
  0xad   : > { %p3302_p2 = pneg %p3301_p12  ;;  %p3308_p8 = por %p3307_p1, %p3306_p11 }
  0xaf   : > { %p3309_p5 = pnand %p3308_p8, %p3302_p2 }
  0xb1   : > { %3312 = shalt.err (!%p3309_p5)
}
  0xb2   : > { %2861 = dma.hbm_to_vmem [thread:$0]  (!%p3943_p0), %s4031_s18, 128, %s4060_s25, %s3950_s0, %s4795_s20, %s4795_s20, %s4794_s27  }
  0xb3   : > { %s631_s10 = scalar_lea.vmem [#allocation21], %s3948_s17  ;;  %s3710_s15 = smov [#allocation6]  }
  0xb4   : > { %s638_s24 = sshll.u32 %s631_s10, 4  ;;  %s4096_s22 = sshll.u32 %s3710_s15, 4  ;;  %s4094_s24 = int_to_ptr.vmem [resolvable:$true] %s638_s24  ;;  %s458_s22 = int_to_ptr.vmem [resolvable:$true] %s4096_s22 }
  0xb5   : > { %s3313_s9 = scalar_lea.hbm %s4066_s19, 256  ;;  %s3318_s8 = scalar_lea.hbm %s4796_s12, 512 }
  0xb6   : > { %p3314_p6 = scmp.ne.s32.totalorder %s4066_s19, %s3313_s9  ;;  %p3319_p9 = scmp.lt.u32.totalorder %s4066_s19, %s4796_s12 }
  0xb7   : > { %p3320_p13 = scmp.lt.u32.totalorder %s3318_s8, %s3313_s9  ;;  %p3322_p12 = scmp.lt.u32.totalorder %s3313_s9, %s4066_s19 }
  0xb8   : > { %p3316_p7 = pnand %p3314_p6, %p3956_p4 }
  0xb9   : > { %p3321_p10 = por %p3320_p13, %p3319_p9 }
  0xba   : > { %p3317_p3 = pneg %p3316_p7 }
  0xbb   : > { %p3323_p2 = por %p3322_p12, %p3321_p10 }
  0xbd   : > { %p3324_p11 = pnand %p3323_p2, %p3317_p3 }
  0xbf   : > { %3327 = shalt.err (!%p3324_p11)
}
  0xc0   : > { %s3328_s18 = scalar_lea.vmem %s4094_s24, 256  ;;  %s3711_s25 = smov [#allocation21]  }
  0xc1   : > { %p3329_p1 = scmp.ne.s32.totalorder %s4094_s24, %s3328_s18  ;;  %s3333_s10 = sshll.u32 %s3711_s25, 4  ;;  %s3334_s10 = int_to_ptr.vmem [resolvable:$false] %s3333_s10 }
  0xc2   : > { %s3335_s15 = scalar_lea.vmem %s3334_s10, 512  ;;  %p3336_p6 = scmp.lt.s32.totalorder %s4094_s24, %s3334_s10 }
  0xc3   : > { %p3331_p8 = pnand %p3329_p1, %p3956_p4  ;;  %p3337_p7 = scmp.lt.s32.totalorder %s3335_s15, %s3328_s18 }
  0xc5   : > { %p3332_p5 = pneg %p3331_p8  ;;  %p3338_p9 = por %p3337_p7, %p3336_p6 }
  0xc7   : > { %p3339_p13 = pnand %p3338_p9, %p3332_p5 }
  0xc9   : > { %3342 = shalt.err (!%p3339_p13)
}
  0xca   : > { %2864 = dma.hbm_to_vmem [thread:$0]  (!%p3943_p0), %s4066_s19, 256, %s4094_s24, %s3950_s0, %s4795_s20, %s4795_s20, %s4794_s27  }
  0xcb   : > { %s3343_s16 = scalar_lea.hbm %s4710_s1, 256  ;;  %p4797_p10 = scmp.ne.s32.totalorder %s4781_s26, 0 }
  0xcc   : > { %p3344_p3 = scmp.ne.s32.totalorder %s4710_s1, %s3343_s16  ;;  %p3350_p11 = scmp.lt.u32.totalorder %s3343_s16, %s4710_s1 }
  0xce   : > { %p3346_p12 = pnand %p3344_p3, %p4797_p10 }
  0xd0   : > { %p3347_p2 = pneg %p3346_p12 }
  0xd2   : > { %p3352_p1 = pnand %p3350_p11, %p3347_p2 }
  0xd4   : > { %3355 = shalt.err (!%p3352_p1)
}
  0xd5   : > { %s3356_s25 = scalar_lea.vmem %s458_s22, 256  ;;  %p3364_p7 = scmp.lt.s32.totalorder %s458_s22, %s458_s22 }
  0xd6   : > { %p3357_p8 = scmp.ne.s32.totalorder %s458_s22, %s3356_s25  ;;  %p3365_p9 = scmp.lt.s32.totalorder %s3356_s25, %s3356_s25 }
  0xd8   : > { %p3359_p5 = pnand %p3357_p8, %p4797_p10  ;;  %p3366_p13 = por %p3365_p9, %p3364_p7 }
  0xda   : > { %p3360_p6 = pneg %p3359_p5 }
  0xdc   : > { %p3367_p0 = pnand %p3366_p13, %p3360_p6 }
  0xde   : > { %3370 = shalt.err (!%p3367_p0)
}
  0xdf   : > { %p4798_p3 = scmp.ne.s32.totalorder %s4779_s28, 0  ;;  %s4799_s19 = smov 8  }
  0xe0   : > { %s4800_s24 = smov 128   ;;  %s3712_s9 = smov [#allocation9]  }
  0xe1   : > { %2830 = dma.hbm_to_vmem [thread:$0]  (!%p4798_p3), %s4710_s1, 256, %s458_s22, [#allocation7], %s4800_s24, %s4800_s24, %s4799_s19  }
  0xe2   : > { %s483_s7 = sshll.u32 %s3712_s9, 4  ;;  %s3713_s16 = smov [#allocation12]   ;;  %s484_s7 = int_to_ptr.vmem [resolvable:$true] %s483_s7 }
  0xe3   : > { %s509_s8 = sshll.u32 %s3713_s16, 4  ;;  %s3371_s18 = scalar_lea.hbm %s4712_s3, 256  ;;  %s510_s8 = int_to_ptr.vmem [resolvable:$true] %s509_s8 }
  0xe4   : > { %p3372_p0 = scmp.ne.s32.totalorder %s4712_s3, %s3371_s18  ;;  %p3378_p11 = scmp.lt.u32.totalorder %s3371_s18, %s4712_s3 }
  0xe6   : > { %p3374_p12 = pnand %p3372_p0, %p4797_p10 }
  0xe8   : > { %p3375_p2 = pneg %p3374_p12 }
  0xea   : > { %p3380_p1 = pnand %p3378_p11, %p3375_p2 }
  0xec   : > { %3383 = shalt.err (!%p3380_p1)
}
  0xed   : > { %s3384_s22 = scalar_lea.vmem %s484_s7, 256  ;;  %p3392_p7 = scmp.lt.s32.totalorder %s484_s7, %s484_s7 }
  0xee   : > { %p3385_p8 = scmp.ne.s32.totalorder %s484_s7, %s3384_s22  ;;  %p3393_p9 = scmp.lt.s32.totalorder %s3384_s22, %s3384_s22 }
  0xf0   : > { %p3387_p5 = pnand %p3385_p8, %p4797_p10  ;;  %p3394_p13 = por %p3393_p9, %p3392_p7 }
  0xf2   : > { %p3388_p6 = pneg %p3387_p5 }
  0xf4   : > { %p3395_p4 = pnand %p3394_p13, %p3388_p6 }
  0xf6   : > { %3398 = shalt.err (!%p3395_p4)
}
  0xf7   : > { %2836 = dma.hbm_to_vmem [thread:$0]  (!%p4798_p3), %s4712_s3, 256, %s484_s7, [#allocation10], %s4800_s24, %s4800_s24, %s4799_s19  }
  0xf8   : > { %s3399_s16 = scalar_lea.hbm %s4714_s5, 256 }
  0xf9   : > { %p3400_p0 = scmp.ne.s32.totalorder %s4714_s5, %s3399_s16  ;;  %p3406_p2 = scmp.lt.u32.totalorder %s3399_s16, %s4714_s5 }
  0xfb   : > { %p3402_p4 = pnand %p3400_p0, %p4797_p10 }
  0xfd   : > { %p3403_p12 = pneg %p3402_p4 }
  0xff   : > { %p3408_p11 = pnand %p3406_p2, %p3403_p12 }
 0x101   : > { %3411 = shalt.err (!%p3408_p11)
}
 0x102   : > { %s3412_s10 = scalar_lea.vmem %s510_s8, 256  ;;  %p3420_p6 = scmp.lt.s32.totalorder %s510_s8, %s510_s8 }
 0x103   : > { %p3413_p1 = scmp.ne.s32.totalorder %s510_s8, %s3412_s10  ;;  %p3421_p7 = scmp.lt.s32.totalorder %s3412_s10, %s3412_s10 }
 0x105   : > { %p3415_p8 = pnand %p3413_p1, %p4797_p10  ;;  %p3422_p9 = por %p3421_p7, %p3420_p6 }
 0x107   : > { %p3416_p5 = pneg %p3415_p8 }
 0x109   : > { %p3423_p13 = pnand %p3422_p9, %p3416_p5 }
 0x10b   : > { %3426 = shalt.err (!%p3423_p13)
}
 0x10c   : > { %2842 = dma.hbm_to_vmem [thread:$0]  (!%p4798_p3), %s4714_s5, 256, %s510_s8, [#allocation13], %s4800_s24, %s4800_s24, %s4799_s19  }
 0x10d   : > { %s4191_s15 = scalar_lea.hbm %s4722_s13, %s3981_s23  ;;  %s652_s9 = scalar_lea.vmem [#allocation22], %s3948_s17 }
 0x10e   : > { %s659_s16 = sshll.u32 %s652_s9, 4  ;;  %s3427_s21 = scalar_lea.hbm %s4191_s15, 256  ;;  %s4194_s16 = int_to_ptr.vmem [resolvable:$true] %s659_s16 }
 0x10f   : > { %p3428_p0 = scmp.ne.s32.totalorder %s4191_s15, %s3427_s21  ;;  %p4801_p4 = scmp.ne.s32.totalorder %s4790_s6, 0 }
 0x110   : > { %s3432_s18 = scalar_lea.hbm %s4722_s13, 512  ;;  %p3433_p11 = scmp.lt.u32.totalorder %s4191_s15, %s4722_s13 }
 0x111   : > { %p3430_p12 = pnand %p3428_p0, %p4801_p4  ;;  %p3434_p1 = scmp.lt.u32.totalorder %s3432_s18, %s3427_s21 }
 0x112   : > { %p3436_p5 = scmp.lt.u32.totalorder %s3427_s21, %s4191_s15 }
 0x113   : > { %p3431_p2 = pneg %p3430_p12  ;;  %p3435_p8 = por %p3434_p1, %p3433_p11 }
 0x115   : > { %p3437_p6 = por %p3436_p5, %p3435_p8 }
 0x117   : > { %p3438_p7 = pnand %p3437_p6, %p3431_p2 }
 0x119   : > { %3441 = shalt.err (!%p3438_p7)
}
 0x11a   : > { %s3442_s17 = scalar_lea.vmem %s4194_s16, 256  ;;  %s3714_s10 = smov [#allocation22]  }
 0x11b   : > { %p3443_p9 = scmp.ne.s32.totalorder %s4194_s16, %s3442_s17  ;;  %s3447_s7 = sshll.u32 %s3714_s10, 4  ;;  %s3448_s7 = int_to_ptr.vmem [resolvable:$false] %s3447_s7 }
 0x11c   : > { %s3449_s22 = scalar_lea.vmem %s3448_s7, 512  ;;  %p3450_p12 = scmp.lt.s32.totalorder %s4194_s16, %s3448_s7 }
 0x11d   : > { %p3445_p13 = pnand %p3443_p9, %p4801_p4  ;;  %p3451_p3 = scmp.lt.s32.totalorder %s3449_s22, %s3442_s17 }
 0x11f   : > { %p3446_p0 = pneg %p3445_p13  ;;  %p3452_p11 = por %p3451_p3, %p3450_p12 }
 0x121   : > { %p3453_p1 = pnand %p3452_p11, %p3446_p0 }
 0x123   : > { %3456 = shalt.err (!%p3453_p1)
}
 0x124   : > { %p4802_p2 = scmp.ne.s32.totalorder %s4789_s14, 0  ;;  %s3715_s11 = smov [#allocation8]  }
 0x125   : > { %s470_s12 = sshll.u32 %s3715_s11, 4  ;;  %s3716_s9 = smov [#allocation11]   ;;  %s471_s12 = int_to_ptr.vmem [resolvable:$true] %s470_s12 }
 0x126   : > { %2867 = dma.hbm_to_vmem [thread:$0]  (!%p4802_p2), %s4191_s15, 256, %s4194_s16, %s3950_s0, %s4795_s20, %s4795_s20, %s4794_s27  }
 0x127   : > { %s496_s21 = sshll.u32 %s3716_s9, 4  ;;  %s3457_s18 = scalar_lea.hbm %s4711_s2, 256  ;;  %s497_s21 = int_to_ptr.vmem [resolvable:$true] %s496_s21 }
 0x128   : > { %p3458_p3 = scmp.ne.s32.totalorder %s4711_s2, %s3457_s18  ;;  %p3464_p6 = scmp.lt.u32.totalorder %s3457_s18, %s4711_s2 }
 0x12a   : > { %p3460_p8 = pnand %p3458_p3, %p4797_p10 }
 0x12c   : > { %p3461_p5 = pneg %p3460_p8 }
 0x12e   : > { %p3466_p7 = pnand %p3464_p6, %p3461_p5 }
 0x130   : > { %3469 = shalt.err (!%p3466_p7)
}
 0x131   : > { %s3470_s15 = scalar_lea.vmem %s471_s12, 256  ;;  %p3478_p12 = scmp.lt.s32.totalorder %s471_s12, %s471_s12 }
 0x132   : > { %p3471_p9 = scmp.ne.s32.totalorder %s471_s12, %s3470_s15  ;;  %p3479_p11 = scmp.lt.s32.totalorder %s3470_s15, %s3470_s15 }
 0x134   : > { %p3473_p13 = pnand %p3471_p9, %p4797_p10  ;;  %p3480_p1 = por %p3479_p11, %p3478_p12 }
 0x136   : > { %p3474_p0 = pneg %p3473_p13 }
 0x138   : > { %p3481_p2 = pnand %p3480_p1, %p3474_p0 }
 0x13a   : > { %3484 = shalt.err (!%p3481_p2)
}
 0x13b   : > { %p4803_p3 = scmp.ne.s32.totalorder %s4779_s28, 0  ;;  %s3485_s9 = scalar_lea.hbm %s4713_s4, 256 }
 0x13c   : > { %p3486_p8 = scmp.ne.s32.totalorder %s4713_s4, %s3485_s9  ;;  %p3492_p6 = scmp.lt.u32.totalorder %s3485_s9, %s4713_s4 }
 0x13d   : > { %2833 = dma.hbm_to_vmem [thread:$0]  (!%p4803_p3), %s4711_s2, 256, %s471_s12, [#allocation7], %s4800_s24, %s4800_s24, %s4799_s19  }
 0x13e   : > { %p3488_p2 = pnand %p3486_p8, %p4797_p10 }
 0x140   : > { %p3489_p5 = pneg %p3488_p2 }
 0x142   : > { %p3494_p7 = pnand %p3492_p6, %p3489_p5 }
 0x144   : > { %3497 = shalt.err (!%p3494_p7)
}
 0x145   : > { %s3498_s23 = scalar_lea.vmem %s497_s21, 256  ;;  %p3506_p12 = scmp.lt.s32.totalorder %s497_s21, %s497_s21 }
 0x146   : > { %p3499_p9 = scmp.ne.s32.totalorder %s497_s21, %s3498_s23  ;;  %p3507_p11 = scmp.lt.s32.totalorder %s3498_s23, %s3498_s23 }
 0x148   : > { %p3501_p13 = pnand %p3499_p9, %p4797_p10  ;;  %p3508_p1 = por %p3507_p11, %p3506_p12 }
 0x14a   : > { %p3502_p0 = pneg %p3501_p13 }
 0x14c   : > { %p3509_p4 = pnand %p3508_p1, %p3502_p0 }
 0x14e   : > { %3512 = shalt.err (!%p3509_p4)
}
 0x14f   : > { %2839 = dma.hbm_to_vmem [thread:$0]  (!%p4803_p3), %s4713_s4, 256, %s497_s21, [#allocation10], %s4800_s24, %s4800_s24, %s4799_s19  }
 0x150   : > { %s3717_s10 = smov [#allocation14]   ;;  %s3718_s16 = smov [#allocation15]  }
 0x151   : > { %s523_s15 = sshll.u32 %s3717_s10, 4  ;;  %s533_s7 = sshll.u32 %s3718_s16, 4  ;;  %s524_s15 = int_to_ptr.vmem [resolvable:$true] %s523_s15  ;;  %s534_s7 = int_to_ptr.vmem [resolvable:$true] %s533_s7 }
 0x152   : > { %s4804_s9 = sld [smem:[#allocation43_spill]] }
 0x158   : > { %s3513_s29 = scalar_lea.hbm %s4804_s9, 16 }
 0x159   : > { %p3514_p4 = scmp.ne.s32.totalorder %s4804_s9, %s3513_s29  ;;  %p3520_p5 = scmp.lt.u32.totalorder %s3513_s29, %s4804_s9 }
 0x15b   : > { %p3516_p8 = pnand %p3514_p4, %p4797_p10 }
 0x15d   : > { %p3517_p2 = pneg %p3516_p8 }
 0x15f   : > { %p3522_p6 = pnand %p3520_p5, %p3517_p2 }
 0x161   : > { %3525 = shalt.err (!%p3522_p6)
}
 0x162   : > { %s3526_s19 = scalar_lea.vmem %s524_s15, 16  ;;  %s3533_s24 = scalar_lea.vmem %s524_s15, 32 }
 0x163   : > { %p3527_p7 = scmp.ne.s32.totalorder %s524_s15, %s3526_s19  ;;  %p3534_p0 = scmp.lt.s32.totalorder %s524_s15, %s524_s15 }
 0x164   : > { %p3535_p12 = scmp.lt.s32.totalorder %s3533_s24, %s3526_s19 }
 0x165   : > { %p3529_p9 = pnand %p3527_p7, %p4797_p10 }
 0x166   : > { %p3536_p11 = por %p3535_p12, %p3534_p0 }
 0x167   : > { %p3530_p13 = pneg %p3529_p9 }
 0x169   : > { %p3537_p1 = pnand %p3536_p11, %p3530_p13 }
 0x16b   : > { %3540 = shalt.err (!%p3537_p1)
}
 0x16c   : > { %2845 = dma.hbm_to_vmem [thread:$0]  (!%p4803_p3), %s4804_s9, 16, %s524_s15, [#allocation13]  }
 0x16d   : > { %s2570_s17 = sshll.u32 %s3927_s30, 5  ;;  %s4805_s22 = sld [smem:[#allocation44_spill]] }
 0x173   : > { %s4806_s11 = smov %s4805_s22  ;;  %s3541_s29 = scalar_lea.hbm %s4805_s22, 256 }
 0x174   : > { %p3542_p4 = scmp.ne.s32.totalorder %s4806_s11, %s3541_s29  ;;  %p3548_p5 = scmp.lt.u32.totalorder %s3541_s29, %s4806_s11 }
 0x176   : > { %p3544_p8 = pnand %p3542_p4, %p4797_p10 }
 0x178   : > { %p3545_p2 = pneg %p3544_p8 }
 0x17a   : > { %p3550_p6 = pnand %p3548_p5, %p3545_p2 }
 0x17c   : > { %3553 = shalt.err (!%p3550_p6)
}
 0x17d   : > { %s3554_s15 = scalar_lea.vmem %s534_s7, 256  ;;  %p3562_p0 = scmp.lt.s32.totalorder %s534_s7, %s534_s7 }
 0x17e   : > { %p3555_p7 = scmp.ne.s32.totalorder %s534_s7, %s3554_s15  ;;  %p3563_p12 = scmp.lt.s32.totalorder %s3554_s15, %s3554_s15 }
 0x180   : > { %p3557_p9 = pnand %p3555_p7, %p4797_p10  ;;  %p3564_p11 = por %p3563_p12, %p3562_p0 }
 0x182   : > { %p3558_p13 = pneg %p3557_p9 }
 0x184   : > { %p3565_p1 = pnand %p3564_p11, %p3558_p13 }
 0x186   : > { %3568 = shalt.err (!%p3565_p1)
}
 0x187   : > { %s4807_s24 = sld [smem:[#allocation35_spill]]  ;;  %s4808_s10 = sld [smem:[#allocation50_spill]] }
 0x188   : > { %2848 = dma.hbm_to_vmem [thread:$0]  (!%p4803_p3), %s4806_s11, 256, %s534_s7, [#allocation16], %s4795_s20, %s4795_s20, %s4794_s27  }
 0x189   : > { %s673_s28 = scalar_lea.vmem [#allocation23], %s2570_s17  ;;  %p4809_p4 = scmp.ne.s32.totalorder %s4790_s6, 0 }
 0x18a   : > { %s680_s22 = sshll.u32 %s673_s28, 4  ;;  %s4309_s22 = int_to_ptr.vmem [resolvable:$true] %s680_s22 }
 0x18d   : > { %s2632_s21 = sshll.u32 %s4807_s24, 9  ;;  %s3574_s18 = scalar_lea.hbm %s4808_s10, 1024 }
 0x18e   : > { %s4307_s16 = scalar_lea.hbm %s4808_s10, %s2632_s21 }
 0x18f   : > { %s3569_s29 = scalar_lea.hbm %s4307_s16, 512  ;;  %p3575_p3 = scmp.lt.u32.totalorder %s4307_s16, %s4808_s10 }
 0x190   : > { %p3570_p10 = scmp.ne.s32.totalorder %s4307_s16, %s3569_s29  ;;  %p3576_p5 = scmp.lt.u32.totalorder %s3574_s18, %s3569_s29 }
 0x191   : > { %p3578_p7 = scmp.lt.u32.totalorder %s3569_s29, %s4307_s16 }
 0x192   : > { %p3572_p8 = pnand %p3570_p10, %p4809_p4  ;;  %p3577_p6 = por %p3576_p5, %p3575_p3 }
 0x194   : > { %p3573_p2 = pneg %p3572_p8  ;;  %p3579_p9 = por %p3578_p7, %p3577_p6 }
 0x196   : > { %p3580_p13 = pnand %p3579_p9, %p3573_p2 }
 0x198   : > { %3583 = shalt.err (!%p3580_p13)
}
 0x199   : > { %s3584_s17 = scalar_lea.vmem %s4309_s22, 512  ;;  %s3719_s15 = smov [#allocation23]  }
 0x19a   : > { %p3585_p0 = scmp.ne.s32.totalorder %s4309_s22, %s3584_s17  ;;  %s3589_s30 = sshll.u32 %s3719_s15, 4  ;;  %s3590_s30 = int_to_ptr.vmem [resolvable:$false] %s3589_s30 }
 0x19b   : > { %s3591_s19 = scalar_lea.vmem %s3590_s30, 1024  ;;  %p3592_p1 = scmp.lt.s32.totalorder %s4309_s22, %s3590_s30 }
 0x19c   : > { %p3587_p12 = pnand %p3585_p0, %p4809_p4  ;;  %p3593_p10 = scmp.lt.s32.totalorder %s3591_s19, %s3584_s17 }
 0x19e   : > { %p3588_p11 = pneg %p3587_p12  ;;  %p3594_p8 = por %p3593_p10, %p3592_p1 }
 0x1a0   : > { %p3595_p3 = pnand %p3594_p8, %p3588_p11 }
 0x1a2   : > { %3598 = shalt.err (!%p3595_p3)
}
 0x1a3   : > { %p4810_p2 = scmp.ne.s32.totalorder %s4789_s14, 0  ;;  %s4811_s6 = sld [smem:[#allocation38_spill]] }
 0x1a5   : > { %2870 = dma.hbm_to_vmem [thread:$0]  (!%p4810_p2), %s4307_s16, 512, %s4309_s22, %s3950_s0, %s4795_s20, %s4795_s20, %s4794_s27  }
 0x1a9   : > { %p4812_p4 = scmp.ne.s32.totalorder %s4811_s6, 0 }
 0x1aa   : > { %s4813_s24 = sld [smem:[#allocation37_spill]] (!%p4812_p4) }
 0x1ab   : > { %692 = sbr.rel (%p4812_p4) target bundleno = 3937 (0xf61), region = 80 }
 0x1b0   : > { %p4814_p5 = scmp.eq.s32.totalorder (!%p4812_p4), %s4813_s24, 0 }
 0x1b2   : > { %3650 = dma.done.wait (%p4814_p5), [#allocation4], 256   ;;  %p4815_p6 = pmov %p4814_p5 }
 0x1b3   : > { %p4816_p7 = pmov %p4814_p5 }
 0x1b4   : > { %3652 = vsyncadd (%p4815_p6), [#allocation4], 4294967040 }
 0x1b5   : > { %3654 = dma.done.wait (%p4816_p7), [#allocation7], 512   ;;  %p4817_p9 = pmov %p4814_p5 }
 0x1b6   : > { %p4818_p13 = pmov %p4814_p5 }
 0x1b7   : > { %3656 = vsyncadd (%p4817_p9), [#allocation7], 4294966784 }
 0x1b8   : > { %3658 = dma.done.wait (%p4818_p13), [#allocation10], 512   ;;  %p4819_p0 = pmov %p4814_p5 }
 0x1ba   : > { %3660 = vsyncadd (%p4819_p0), [#allocation10], 4294966784  ;;  %p4820_p12 = pmov %p4819_p0 }
 0x1bb   : > { %p4821_p11 = pmov %p4819_p0 }
 0x1bc   : > { %3662 = dma.done.wait (%p4820_p12), [#allocation13], 272  }
 0x1bd   : > { %3664 = vsyncadd (%p4821_p11), [#allocation13], 4294967024  ;;  %p4822_p1 = pmov %p4819_p0 }
 0x1be   : > { %p4823_p10 = pmov %p4819_p0 }
 0x1bf   : > { %3666 = dma.done.wait (%p4822_p1), [#allocation16], 256  }
 0x1c0   : > { %3668 = vsyncadd (%p4823_p10), [#allocation16], 4294967040  ;;  %s4824_s14 = sld [smem:[#allocation32_spill]]  ;;  %s4825_s0 = sld [smem:[#allocation40_spill]] }
 0x1c1   : > { %s726_s27 = sand.u32 1, %s4813_s24  }
 0x1c2   : > { %s727_s21 = scalar_lea.sflag [#allocation4], %s726_s27 }
 0x1c6   : > { %s4360_s20 = sand.u32 1, %s4824_s14   ;;  %p4826_p8 = scmp.ne.s32.totalorder %s4825_s0, 0 }
 0x1c7   : > { %s729_s26 = scalar_lea.vmem [#allocation17], %s4360_s20 }
 0x1c8   : > { %3670 = dma.done.wait (%p4826_p8), %s727_s21, 1552  }
 0x1c9   : > { %3672 = vsyncadd (%p4826_p8), %s727_s21, 4294965744  ;;  %s4368_s12 = sshll.u32 %s4360_s20, 4  ;;  %s2583_s16 = sshll.u32 %s4360_s20, 3 }
 0x1ca   : > { %s2587_s28 = sshll.u32 %s4360_s20, 5  ;;  %s738_s22 = scalar_lea.vmem [#allocation18], %s4368_s12 }
 0x1cb   : > { %s4373_s29 = scalar_lea.vmem [#allocation19], %s2583_s16  ;;  %s4375_s7 = scalar_lea.vmem [#allocation20], %s2583_s16 }
 0x1cc   : > { %s765_s8 = scalar_lea.vmem [#allocation21], %s4368_s12  ;;  %s774_s18 = scalar_lea.vmem [#allocation22], %s4368_s12 }
 0x1cd   : > { %s4379_s25 = scalar_lea.vmem [#allocation23], %s2587_s28  ;;  %s4827_s23 = sld [smem:[#allocation34_spill]] }
 0x1d3   : > { %p2588_p3 = scmp.ne.s32.totalorder %s4827_s23, 0 }
 0x1d4   : > { %v861_v0 = vld [vmem:[#allocation3] sm:$0xff] (!%p2588_p3)  ;;  %vm863_vm0 = vcmask (!%p2588_p3), 261120   ;;  %v862_v1 = vld [vmem:[#allocation3 + $0x8] sm:$0xff] (!%p2588_p3) }
 0x1d5   : > { %860 = sbr.rel (%p2588_p3) target bundleno = 476 (0x1dc), region = 144  ;;  %864 = vst.msk [vmem:[#allocation2] sm:$0xff] (!%p2588_p3), %vm863_vm0, %v861_v0  ;;  %865 = vst.msk [vmem:[#allocation2 + $0x8] sm:$0xff] (!%p2588_p3), %vm863_vm0, %v862_v1 }
 0x1dc PF: > { %v866_v2 = vld [vmem:[#allocation2] sm:$0xff]  ;;  %vm871_vm1 = vcmask 261120   ;;  %v867_v3 = vld [vmem:[#allocation2 + $0x8] sm:$0xff]  ;;  %v3720_v9 = vmov 0.0   ;;  %vm3721_vm2 = vmmov 0   ;;  %vm958_vm3 = vcmask 130048  }
 0x1dd   : > { %v869_v4 = vmul.f32 %v866_v2, %v866_v2  ;;  %v870_v5 = vmul.f32 %v867_v3, %v867_v3  ;;  %v3088_v8 = vld [vmem:[%s738_s22] sm:$0xff]   ;;  %2670 = vmatprep.subr.bf16.mxu0 %v3720_v9  ;;  %2674 = vmatprep.mubr.msk.bf16.mxu0 %vm3721_vm2, %v3720_v9  ;;  %v3089_v10 = vld [vmem:[%s738_s22 + $0x8] sm:$0xff]   ;;  %s3722_s17 = smov 112   ;;  %s3723_s15 = smov 36   ;;  %vm1249_vm4 = vcmask 31744   ;;  %vm1318_vm5 = vcmask 64512  }
 0x1de   : > { %2671 = vmatpush3.bf16.msra.mxu0 %v3088_v8  ;;  %2678 = vmatprep.subr.bf16.mxu1 %v3720_v9  ;;  %v2589_v20 = vld [vmem:[%s729_s26] ss:$0 sm:$0xff]  ;;  %v1117_v34 = vld [vmem:[#allocation11 + $0x8] sm:$0xff]  ;;  %s3724_s30 = smov 32   ;;  %v1119_v35 = vld [vmem:[#allocation12 + $0x8] sm:$0xff]  ;;  %s3725_s19 = smov 64  }
 0x1df   : > { %v872_v6 = vsel %vm871_vm1, %v869_v4, 0.0  ;;  %v875_v7 = vsel %vm871_vm1, %v870_v5, 0.0  ;;  %2672 = vmatprep.subr.bf16.mxu0 %v3720_v9  ;;  %2680 = vmatprep.mubr.msk.bf16.mxu1 %vm3721_vm2, %v3720_v9  ;;  %v1118_v33 = vld [vmem:[#allocation12] sm:$0xff]  ;;  %v1116_v5 = vld [vmem:[#allocation11] sm:$0xff]  ;;  %s3726_s6 = smov 124   ;;  %s3727_s24 = smov 48  }
 0x1e0   : > { %873 = vadd.xlane.f32.xlu0 %v872_v6  ;;  %v3090_v40 = vld [vmem:[%s4373_s29] sm:$0xff]   ;;  %v3091_v60 = vld [vmem:[%s4375_s7] sm:$0xff]   ;;  %s3728_s14 = smov 96   ;;  %s3729_s0 = smov 100   ;;  %vm1321_vm6 = vcmask 97280   ;;  %vm1326_vm7 = vcmask 195584  }
 0x1e1   : > { %2679 = vmatpush3.bf16.msra.mxu1 %v3090_v40  ;;  %s3730_s27 = smov 40   ;;  %s3731_s21 = smov 8   ;;  %vm1329_vm8 = vcmask 228352   ;;  %vm1334_vm9 = vcmask 326656   ;;  %vm1340_vm10 = vcmask 392192   ;;  %vm1343_vm11 = vcmask 457728  }
 0x1e2   : > { %2673 = vmatpush3.bf16.msra.mxu0 %v3089_v10  ;;  %2684 = vmatprep.subr.bf16.mxu1 %v3720_v9  ;;  %s3732_s16 = smov 56   ;;  %s3733_s28 = smov 24   ;;  %vm1337_vm12 = vcmask 359424   ;;  %vm1346_vm13 = vcmask 490496   ;;  %vm2134_vm14 = vcmask 523264  }
 0x1e3   : > { %2702 = vmatprep.subr.bf16.mxu0 %v3720_v9  ;;  %s3734_s22 = smov 16   ;;  %s3735_s29 = smov 120  }
 0x1e4   : > { %876 = vadd.xlane.f32.xlu0 %v875_v7  ;;  %s3736_s7 = smov 104   ;;  %s3737_s23 = smov 108  }
 0x1e5   : > { %s4828_s20 = sld [smem:[#allocation34_spill]] }
 0x1eb   : > { %p2618_p2 = scmp.ne.s32.totalorder %s4828_s20, 1 }
 0x1ec   : > { %vm3745_vm15 = vmmov (!%p2618_p2), 0  }
 0x26d   : > { %v874_v11 = vpop.xlane.xlu0 %873 }
 0x26e   : > { %v879_v12 = vmul.f32 0.03125, %v874_v11 }
 0x270   : > { %v881_v13 = vadd.f32 1e-06, %v879_v12 }
 0x271   : > { %v877_v14 = vpop.xlane.xlu0 %876 }
 0x272   : > { %3100 = vrsqrt.f32 %v881_v13  ;;  %v880_v15 = vmul.f32 0.03125, %v877_v14 }
 0x274   : > { %v882_v16 = vadd.f32 1e-06, %v880_v15  ;;  %v1114_v15 = vld [vmem:[#allocation9] sm:$0xff] }
 0x276   : > { %3102 = vrsqrt.f32 %v882_v16 }
 0x27c   : > { %v3101_v17 = vpop.eup %3100 }
 0x27d   : > { %v885_v18 = vmul.f32 %v3101_v17, %v866_v2  ;;  %v1115_v17 = vld [vmem:[#allocation9 + $0x8] sm:$0xff] }
 0x27f   : > { %v893_v22 = vmul.f32 %v2589_v20, %v885_v18  ;;  %v1112_v18 = vld [vmem:[#allocation8] sm:$0xff] }
 0x280   : > { %v3103_v19 = vpop.eup %3102 }
 0x281   : > { %v886_v21 = vmul.f32 %v3103_v19, %v867_v3  ;;  %v1113_v19 = vld [vmem:[#allocation8 + $0x8] sm:$0xff] }
 0x283   : > { %v894_v23 = vmul.f32 %v2589_v20, %v886_v21 }
 0x285   : > { %v895_v24 = vpack.c.bf16 %v894_v23, %v893_v22 }
 0x287   : > { %2675 = vmatmul.mubr.msk.bf16.vlgmr.msra.gmra.mrb[0].mxu0 %vm871_vm1, %v895_v24 }
 0x288   : > { %2704 = vmatprep.mubr.msk.bf16.mxu0 %vm3721_vm2, %v3720_v9 }
 0x35a   : > { %v4397_v25 = vpop.f32.mrb[0].mxu0 }
 0x35b   : > { %v2676_v26 = vpop.f32.mrb[1].mxu0  ;;  %v956_v27 = vmul.f32 %v4397_v25, %v4397_v25 }
 0x35c   : > { %v4401_v28 = vpop.f32.mrb[2].mxu0 }
 0x35d   : > { %981 = vrot.lane.b32.xlu1 %v956_v27, %s3722_s17  ;;  %v2677_v29 = vpop.f32.mrb[3].mxu0  ;;  %v959_v30 = vsel %vm958_vm3, %v956_v27, 0.0  ;;  %v957_v31 = vmul.f32 %v4401_v28, %v4401_v28 }
 0x35e   : > { %960 = vadd.xlane.f32.xlu0 %v959_v30 }
 0x35f   : > { %v962_v32 = vsel %vm958_vm3, %v957_v31, 0.0 }
 0x361   : > { %983 = vrot.lane.b32.xlu1 %v957_v31, %s3722_s17 }
 0x385   : > { %963 = vadd.xlane.f32.xlu1 %v962_v32 }
 0x396   : > { %1189 = vrot.lane.b32.xlu1 %v1118_v33, %s3723_s15 }
 0x39a   : > { %1181 = vrot.lane.b32.xlu1 %v1117_v34, %s3724_s30 }
 0x39e   : > { %1209 = vrot.lane.b32.xlu1 %v1119_v35, %s3724_s30 }
 0x3cf   : > { %v982_v36 = vpop.permute.xlu1 %981 }
 0x3d0   : > { %v987_v37 = vsel %vm958_vm3, %v982_v36, 0.0 }
 0x3d1   : > { %988 = vadd.xlane.f32.xlu0 %v987_v37 }
 0x3d3   : > { %v984_v38 = vpop.permute.xlu1 %983 }
 0x3d4   : > { %v990_v39 = vsel %vm958_vm3, %v984_v38, 0.0 }
 0x3d5   : > { %991 = vadd.xlane.f32.xlu0 %v990_v39 }
 0x3eb   : > { %974 = vrot.lane.b32.xlu0 %v2589_v20, %s3725_s19  ;;  %v961_v41 = vpop.xlane.xlu0 %960  ;;  %s3740_s19 = smov 12  }
 0x3ec   : > { %v966_v43 = vmul.f32 0.0625, %v961_v41 }
 0x3ee   : > { %v968_v45 = vadd.f32 1e-06, %v966_v43 }
 0x3f0   : > { %3104 = vrsqrt.f32 %v968_v45 }
 0x3fa   : > { %v3105_v49 = vpop.eup %3104 }
 0x3fb   : > { %v972_v55 = vmul.f32 %v3105_v49, %v4397_v25 }
 0x412   : > { %v964_v42 = vpop.xlane.xlu1 %963 }
 0x413   : > { %v967_v44 = vmul.f32 0.0625, %v964_v42 }
 0x415   : > { %v969_v46 = vadd.f32 1e-06, %v967_v44 }
 0x416   : > { %v1190_v6 = vpop.permute.xlu1 %1189 }
 0x417   : > { %3106 = vrsqrt.f32 %v969_v46  ;;  %v1195_v7 = vmul.f32 %v1190_v6, %v4397_v25 }
 0x41a   : > { %v1182_v27 = vpop.permute.xlu1 %1181 }
 0x41b   : > { %v1186_v32 = vmul.f32 %v1182_v27, %v4401_v28 }
 0x41e   : > { %v1210_v30 = vpop.permute.xlu1 %1209 }
 0x41f   : > { %v1214_v39 = vmul.f32 %v1210_v30, %v4401_v28 }
 0x421   : > { %v3107_v51 = vpop.eup %3106 }
 0x422   : > { %v973_v56 = vmul.f32 %v3107_v51, %v4401_v28 }
 0x45e   : > { %v989_v47 = vpop.xlane.xlu0 %988 }
 0x45f   : > { %v993_v48 = vmul.f32 0.0625, %v989_v47 }
 0x461   : > { %v995_v50 = vadd.f32 1e-06, %v993_v48 }
 0x462   : > { %v992_v52 = vpop.xlane.xlu0 %991 }
 0x463   : > { %3108 = vrsqrt.f32 %v995_v50  ;;  %v994_v53 = vmul.f32 0.0625, %v992_v52 }
 0x465   : > { %v996_v54 = vadd.f32 1e-06, %v994_v53 }
 0x466   : > { %v975_v57 = vpop.permute.xlu0 %974 }
 0x467   : > { %3110 = vrsqrt.f32 %v996_v54  ;;  %v977_v58 = vmul.f32 %v975_v57, %v972_v55  ;;  %v978_v59 = vmul.f32 %v975_v57, %v973_v56 }
 0x469   : > { %v1003_v61 = vpack.c.bf16 %v978_v59, %v977_v58 }
 0x46b   : > { %2681 = vmatmul.mubr.msk.bf16.vlgmr.msra.gmra.mrb[0].mxu1 %vm958_vm3, %v1003_v61 }
 0x46c   : > { %2685 = vmatpush3.bf16.msra.mxu1 %v3091_v60  ;;  %2686 = vmatprep.mubr.msk.bf16.mxu1 %vm3721_vm2, %v3720_v9 }
 0x46d   : > { %v3109_v62 = vpop.eup %3108  ;;  %2690 = vmatprep.subr.bf16.mxu1 %v3720_v9 }
 0x46e   : > { %v999_v63 = vmul.f32 %v3109_v62, %v4397_v25 }
 0x470   : > { %v1001_v2 = vmul.f32 %v999_v63, %v975_v57 }
 0x471   : > { %v3111_v0 = vpop.eup %3110 }
 0x472   : > { %v1000_v1 = vmul.f32 %v3111_v0, %v4401_v28 }
 0x474   : > { %v1002_v3 = vmul.f32 %v1000_v1, %v975_v57 }
 0x476   : > { %v1056_v4 = vpack.c.bf16 %v1002_v3, %v1001_v2 }
 0x478   : > { %1060 = vrot.lane.b32.xlu0 %v1056_v4, %s3722_s17 }
 0x47c   : > { %1191 = vrot.lane.b32.xlu0 %v1119_v35, %s3723_s15 }
 0x480   : > { %1215 = vrot.lane.b32.xlu0 %v1116_v5, %s3723_s15 }
 0x484   : > { %1217 = vrot.lane.b32.xlu0 %v1117_v34, %s3723_s15  ;;  %s3738_s15 = smov 116  }
 0x488   : > { %1179 = vrot.lane.b32.xlu0 %v1116_v5, %s3724_s30 }
 0x48c   : > { %1207 = vrot.lane.b32.xlu0 %v1118_v33, %s3724_s30 }
 0x490   : > { %1199 = vrot.lane.b32.xlu0 %v1195_v7, %s3726_s6 }
 0x4ea   : > { %v1061_v8 = vpop.permute.xlu0 %1060 }
 0x4eb   : > { %2687 = vmatmul.mubr.msk.bf16.vlgmr.msra.gmra.mrb[4].mxu1 %vm958_vm3, %v1061_v8 }
 0x4ec   : > { %2692 = vmatprep.mubr.msk.bf16.mxu1 %vm3721_vm2, %v3720_v9 }
 0x4ee   : > { %v1192_v10 = vpop.permute.xlu0 %1191 }
 0x4ef   : > { %v1196_v11 = vmul.f32 %v1192_v10, %v4401_v28 }
 0x4f1   : > { %1201 = vrot.lane.b32.xlu1 %v1196_v11, %s3726_s6 }
 0x4f2   : > { %v1216_v12 = vpop.permute.xlu0 %1215 }
 0x4f3   : > { %v1221_v13 = vmul.f32 %v1216_v12, %v4397_v25 }
 0x4f5   : > { %1225 = vrot.lane.b32.xlu0 %v1221_v13, %s3726_s6 }
 0x4f6   : > { %v1218_v14 = vpop.permute.xlu0 %1217 }
 0x4f7   : > { %v1222_v16 = vmul.f32 %v1218_v14, %v4401_v28 }
 0x4f9   : > { %1227 = vrot.lane.b32.xlu1 %v1222_v16, %s3726_s6  ;;  %1132 = vrot.lane.b32.xlu0 %v1114_v15, %s3727_s24  ;;  %s3741_s6 = smov 80  }
 0x4fa   : > { %v1180_v26 = vpop.permute.xlu0 %1179 }
 0x4fb   : > { %v1185_v33 = vmul.f32 %v1180_v26, %v4397_v25 }
 0x4fd   : > { %1134 = vrot.lane.b32.xlu1 %v1115_v17, %s3727_s24  ;;  %1158 = vrot.lane.b32.xlu0 %v1112_v18, %s3727_s24 }
 0x4fe   : > { %v1208_v29 = vpop.permute.xlu0 %1207 }
 0x4ff   : > { %v1213_v40 = vmul.f32 %v1208_v29, %v4397_v25 }
 0x501   : > { %1160 = vrot.lane.b32.xlu1 %v1113_v19, %s3727_s24  ;;  %s3743_s24 = smov 88  }
 0x502   : > { %v1200_v31 = vpop.permute.xlu0 %1199 }
 0x503   : > { %v1205_v35 = vsub.f32 %v1185_v33, %v1200_v31 }
 0x53e   : > { %v4438_v20 = vpop.f32.mrb[0].mxu1 }
 0x53f   : > { %v2682_v21 = vpop.f32.mrb[1].mxu1 }
 0x540   : > { %v4440_v22 = vpop.f32.mrb[2].mxu1 }
 0x541   : > { %v2683_v23 = vpop.f32.mrb[3].mxu1  ;;  %v4444_v24 = vpack.i.bf16 %v4440_v22, %v4438_v20 }
 0x563   : > { %v1202_v34 = vpop.permute.xlu1 %1201 }
 0x564   : > { %v1206_v36 = vsub.f32 %v1186_v32, %v1202_v34 }
 0x566   : > { %v2978_v37 = vpack.i.bf16 %v1206_v36, %v1205_v35 }
 0x567   : > { %v1226_v38 = vpop.permute.xlu0 %1225 }
 0x568   : > { %2979 = vrot.lane.b32.xlu0 %v2978_v37, %s3728_s14  ;;  %v1231_v42 = vadd.f32 %v1226_v38, %v1213_v40 }
 0x56b   : > { %v1228_v41 = vpop.permute.xlu1 %1227  ;;  %v1133_v44 = vpop.permute.xlu0 %1132 }
 0x56c   : > { %v1232_v43 = vadd.f32 %v1228_v41, %v1214_v39  ;;  %1122 = vrot.lane.b32.xlu0 %v1112_v18, %s3724_s30  ;;  %v1138_v46 = vmul.f32 %v1133_v44, %v4438_v20 }
 0x56e   : > { %v2983_v45 = vpack.i.bf16 %v1232_v43, %v1231_v42 }
 0x56f   : > { %v1159_v47 = vpop.permute.xlu0 %1158  ;;  %v1135_v28 = vpop.permute.xlu1 %1134 }
 0x570   : > { %1150 = vrot.lane.b32.xlu0 %v1114_v15, %s3724_s30  ;;  %2984 = vrot.lane.b32.xlu1 %v2983_v45, %s3729_s0  ;;  %v1164_v25 = vmul.f32 %v1159_v47, %v4438_v20  ;;  %v1139_v48 = vmul.f32 %v1135_v28, %v4440_v22 }
 0x573   : > { %v1161_v49 = vpop.permute.xlu1 %1160 }
 0x574   : > { %1142 = vrot.lane.b32.xlu0 %v1138_v46, %s3722_s17  ;;  %1124 = vrot.lane.b32.xlu1 %v1113_v19, %s3724_s30  ;;  %v1165_v50 = vmul.f32 %v1161_v49, %v4440_v22 }
 0x578   : > { %1168 = vrot.lane.b32.xlu0 %v1164_v25, %s3722_s17  ;;  %1152 = vrot.lane.b32.xlu1 %v1115_v17, %s3724_s30  ;;  %s3739_s30 = smov 4  }
 0x57c   : > { %1144 = vrot.lane.b32.xlu1 %v1139_v48, %s3722_s17 }
 0x580   : > { %1170 = vrot.lane.b32.xlu1 %v1165_v50, %s3722_s17 }
 0x5be   : > { %v4463_v51 = vpop.f32.mrb[4].mxu1 }
 0x5bf   : > { %v2688_v52 = vpop.f32.mrb[5].mxu1 }
 0x5c0   : > { %v4465_v53 = vpop.f32.mrb[6].mxu1 }
 0x5c1   : > { %v2689_v54 = vpop.f32.mrb[7].mxu1  ;;  %v3038_v55 = vpack.i.bf16 %v4465_v53, %v4463_v51  ;;  %v4471_v56 = vpack.c.bf16 %v4465_v53, %v4463_v51 }
 0x5da   : > { %v2980_v57 = vpop.permute.xlu0 %2979 }
 0x5db   : > { %v2982_v60 = vunpack.i.h.bf16 %v2980_v57  ;;  %v2981_v61 = vunpack.i.l.bf16 %v2980_v57 }
 0x5de   : > { %v1123_v58 = vpop.permute.xlu0 %1122 }
 0x5df   : > { %v1128_v13 = vmul.f32 %v1123_v58, %v4438_v20 }
 0x5e2   : > { %v2985_v59 = vpop.permute.xlu1 %2984  ;;  %v1151_v0 = vpop.permute.xlu0 %1150 }
 0x5e3   : > { %v2987_v62 = vunpack.i.h.bf16 %v2985_v59  ;;  %v2986_v63 = vunpack.i.l.bf16 %v2985_v59  ;;  %v1156_v11 = vmul.f32 %v1151_v0, %v4438_v20 }
 0x5e5   : > { %v1251_v1 = vsel %vm1249_vm4, %v2982_v60, %v2987_v62  ;;  %v1250_v2 = vsel %vm1249_vm4, %v2981_v61, %v2986_v63 }
 0x5e6   : > { %v1125_v3 = vpop.permute.xlu1 %1124  ;;  %v2998_v4 = vpack.i.bf16 %v1251_v1, %v1250_v2  ;;  %v1143_v5 = vpop.permute.xlu0 %1142 }
 0x5e7   : > { %v1129_v8 = vmul.f32 %v1125_v3, %v4440_v22  ;;  %v4483_v18 = vsub.f32 %v1128_v13, %v1143_v5 }
 0x5e8   : > { %2999 = vrot.lane.b32.xlu1 %v2998_v4, %s3730_s27  ;;  %2989 = vrot.lane.b32.xlu0 %v2998_v4, %s3731_s21 }
 0x5ea   : > { %v1153_v6 = vpop.permute.xlu1 %1152  ;;  %v1169_v10 = vpop.permute.xlu0 %1168 }
 0x5eb   : > { %v1157_v12 = vmul.f32 %v1153_v6, %v4440_v22  ;;  %v1174_v16 = vadd.f32 %v1169_v10, %v1156_v11 }
 0x5ec   : > { %3009 = vrot.lane.b32.xlu1 %v2998_v4, %s3732_s16  ;;  %2994 = vrot.lane.b32.xlu0 %v2998_v4, %s3733_s28 }
 0x5ee   : > { %v1145_v7 = vpop.permute.xlu1 %1144 }
 0x5ef   : > { %v4481_v14 = vsub.f32 %v1129_v8, %v1145_v7 }
 0x5f0   : > { %3004 = vrot.lane.b32.xlu0 %v4444_v24, %s3731_s21 }
 0x5f1   : > { %v3018_v21 = vpack.i.bf16 %v4481_v14, %v4483_v18 }
 0x5f2   : > { %v1171_v15 = vpop.permute.xlu1 %1170 }
 0x5f3   : > { %v1175_v17 = vadd.f32 %v1171_v15, %v1157_v12 }
 0x5f4   : > { %3014 = vrot.lane.b32.xlu0 %v4444_v24, %s3734_s22 }
 0x5f5   : > { %v3033_v19 = vpack.i.bf16 %v1175_v17, %v1174_v16 }
 0x5f7   : > { %3034 = vrot.lane.b32.xlu1 %v3033_v19, %s3735_s29 }
 0x5f8   : > { %3019 = vrot.lane.b32.xlu0 %v3018_v21, %s3736_s7 }
 0x5fb   : > { %3039 = vrot.lane.b32.xlu1 %v3038_v55, %s3731_s21 }
 0x5fc   : > { %3024 = vrot.lane.b32.xlu0 %v3033_v19, %s3737_s23 }
 0x5ff   : > { %3044 = vrot.lane.b32.xlu1 %v3038_v55, %s3734_s22 }
 0x600   : > { %3029 = vrot.lane.b32.xlu0 %v3018_v21, %s3738_s15 }
 0x603   : > { %3049 = vrot.lane.b32.xlu1 %v3038_v55, %s3733_s28 }
 0x604   : > { %3059 = vrot.lane.b32.xlu0 %v4444_v24, %s3733_s28 }
 0x607   : > { %3054 = vrot.lane.b32.xlu1 %v3033_v19, %s3739_s30 }
 0x608   : > { %3069 = vrot.lane.b32.xlu0 %v3033_v19, %s3734_s22 }
 0x60b   : > { %3064 = vrot.lane.b32.xlu1 %v3018_v21, %s3740_s19 }
 0x65a   : > { %v2990_v23 = vpop.permute.xlu0 %2989  ;;  %v4495_v27 = vpop.permute.xlu1 %2999 }
 0x65b   : > { %v2992_v33 = vunpack.i.h.bf16 %v2990_v23  ;;  %v2991_v34 = vunpack.i.l.bf16 %v2990_v23  ;;  %v3002_v37 = vunpack.i.h.bf16 %v4495_v27  ;;  %v3001_v38 = vunpack.i.l.bf16 %v4495_v27 }
 0x65d   : > { %v1397_v40 = vsel %vm1318_vm5, %v4465_v53, %v2992_v33  ;;  %v1396_v41 = vsel %vm1318_vm5, %v4463_v51, %v2991_v34 }
 0x65e   : > { %v2995_v26 = vpop.permute.xlu0 %2994  ;;  %v4497_v30 = vpop.permute.xlu1 %3009 }
 0x65f   : > { %v2997_v45 = vunpack.i.h.bf16 %v2995_v26  ;;  %v2996_v46 = vunpack.i.l.bf16 %v2995_v26  ;;  %v3012_v16 = vunpack.i.h.bf16 %v4497_v30  ;;  %v3011_v17 = vunpack.i.l.bf16 %v4497_v30 }
 0x662   : > { %v3005_v29 = vpop.permute.xlu0 %3004 }
 0x663   : > { %v3007_v52 = vunpack.i.h.bf16 %v3005_v29  ;;  %v3006_v51 = vunpack.i.l.bf16 %v3005_v29 }
 0x666   : > { %v4499_v31 = vpop.permute.xlu0 %3014 }
 0x667   : > { %v3017_v4 = vunpack.i.h.bf16 %v4499_v31  ;;  %v3016_v5 = vunpack.i.l.bf16 %v4499_v31 }
 0x669   : > { %v3035_v32 = vpop.permute.xlu1 %3034 }
 0x66a   : > { %v3020_v35 = vpop.permute.xlu0 %3019  ;;  %v3037_v57 = vunpack.i.h.bf16 %v3035_v32  ;;  %v3036_v58 = vunpack.i.l.bf16 %v3035_v32 }
 0x66b   : > { %v3022_v24 = vunpack.i.h.bf16 %v3020_v35  ;;  %v3021_v36 = vunpack.i.l.bf16 %v3020_v35 }
 0x66d   : > { %v3040_v39 = vpop.permute.xlu1 %3039  ;;  %v1320_v25 = vsel %vm1318_vm5, %v4440_v22, %v3022_v24  ;;  %v1319_v48 = vsel %vm1318_vm5, %v4438_v20, %v3021_v36 }
 0x66e   : > { %v3042_v42 = vunpack.i.h.bf16 %v3040_v39  ;;  %v3041_v43 = vunpack.i.l.bf16 %v3040_v39  ;;  %v3025_v44 = vpop.permute.xlu0 %3024 }
 0x66f   : > { %v3027_v47 = vunpack.i.h.bf16 %v3025_v44  ;;  %v3026_v28 = vunpack.i.l.bf16 %v3025_v44 }
 0x670   : > { %v1398_v49 = vsel %vm958_vm3, %v1396_v41, %v3041_v43  ;;  %v1399_v50 = vsel %vm958_vm3, %v1397_v40, %v3042_v42 }
 0x671   : > { %v1322_v53 = vsel %vm1321_vm6, %v1319_v48, %v3026_v28  ;;  %v1323_v54 = vsel %vm1321_vm6, %v1320_v25, %v3027_v47  ;;  %v3045_v55 = vpop.permute.xlu1 %3044  ;;  %v1400_v22 = vsel %vm1326_vm7, %v1398_v49, %v2996_v46  ;;  %v1401_v20 = vsel %vm1326_vm7, %v1399_v50, %v2997_v45 }
 0x672   : > { %v3047_v59 = vunpack.i.h.bf16 %v3045_v55  ;;  %v3046_v60 = vunpack.i.l.bf16 %v3045_v55  ;;  %v3030_v61 = vpop.permute.xlu0 %3029  ;;  %v1324_v2 = vsel %vm958_vm3, %v1322_v53, %v3006_v51  ;;  %v1325_v3 = vsel %vm958_vm3, %v1323_v54, %v3007_v52 }
 0x673   : > { %v3032_v62 = vunpack.i.h.bf16 %v3030_v61  ;;  %v3031_v63 = vunpack.i.l.bf16 %v3030_v61 }
 0x674   : > { %v1402_v0 = vsel %vm871_vm1, %v1400_v22, %v3046_v60  ;;  %v1403_v1 = vsel %vm871_vm1, %v1401_v20, %v3047_v59  ;;  %v1411_v22 = vld [vmem:[#allocation6] sm:$0xff] }
 0x675   : > { %v1327_v6 = vsel %vm1326_vm7, %v1324_v2, %v3031_v63  ;;  %v1328_v7 = vsel %vm1326_vm7, %v1325_v3, %v3032_v62  ;;  %v3050_v8 = vpop.permute.xlu1 %3049  ;;  %v1404_v19 = vsel %vm1334_vm9, %v1402_v0, %v3001_v38  ;;  %v1405_v21 = vsel %vm1334_vm9, %v1403_v1, %v3002_v37  ;;  %v1412_v0 = vld [vmem:[#allocation6 + $0x8] sm:$0xff] }
 0x676   : > { %v1330_v10 = vsel %vm1329_vm8, %v1327_v6, %v3036_v58  ;;  %v1331_v11 = vsel %vm1329_vm8, %v1328_v7, %v3037_v57  ;;  %v3052_v12 = vunpack.i.h.bf16 %v3050_v8  ;;  %v3051_v13 = vunpack.i.l.bf16 %v3050_v8  ;;  %v3060_v15 = vpop.permute.xlu0 %3059 }
 0x677   : > { %v1332_v27 = vsel %vm871_vm1, %v1330_v10, %v3016_v5  ;;  %v1333_v29 = vsel %vm871_vm1, %v1331_v11, %v3017_v4  ;;  %v3062_v41 = vunpack.i.h.bf16 %v3060_v15  ;;  %v3061_v42 = vunpack.i.l.bf16 %v3060_v15 }
 0x678   : > { %v1406_v23 = vsel %vm1340_vm10, %v1404_v19, %v3051_v13  ;;  %v1407_v26 = vsel %vm1340_vm10, %v1405_v21, %v3052_v12  ;;  %v1335_v24 = vsel %vm1334_vm9, %v1332_v27, %v4483_v18  ;;  %v1336_v36 = vsel %vm1334_vm9, %v1333_v29, %v4481_v14 }
 0x679   : > { %v3055_v31 = vpop.permute.xlu1 %3054  ;;  %v1408_v32 = vsel %vm1343_vm11, %v1406_v23, %v3011_v17  ;;  %v1409_v33 = vsel %vm1343_vm11, %v1407_v26, %v3012_v16 }
 0x67a   : > { %v3057_v34 = vunpack.i.h.bf16 %v3055_v31  ;;  %v3056_v30 = vunpack.i.l.bf16 %v3055_v31  ;;  %v1410_v35 = vpack.c.bf16 %v1409_v33, %v1408_v32  ;;  %v3070_v39 = vpop.permute.xlu0 %3069 }
 0x67b   : > { %v3072_v18 = vunpack.i.h.bf16 %v3070_v39  ;;  %v3071_v46 = vunpack.i.l.bf16 %v3070_v39 }
 0x67c   : > { %v1338_v37 = vsel %vm1337_vm12, %v1335_v24, %v3056_v30  ;;  %v1339_v38 = vsel %vm1337_vm12, %v1336_v36, %v3057_v34  ;;  %1539 = vrot.lane.b32.xlu1 %v1410_v35, %s3722_s17  ;;  %v1417_v40 = vsel %vm958_vm3, %v1410_v35, 0 }
 0x67d   : > { %v3065_v43 = vpop.permute.xlu1 %3064  ;;  %2691 = vmatpush3.bf16.xpose.msra.mxu1 %v1417_v40  ;;  %v1341_v14 = vsel %vm1340_vm10, %v1338_v37, %v3061_v42  ;;  %v1342_v47 = vsel %vm1340_vm10, %v1339_v38, %v3062_v41 }
 0x67e   : > { %v3067_v44 = vunpack.i.h.bf16 %v3065_v43  ;;  %v3066_v45 = vunpack.i.l.bf16 %v3065_v43  ;;  %2696 = vmatprep.subr.bf16.mxu1 %v3720_v9 }
 0x680   : > { %v1344_v28 = vsel %vm1343_vm11, %v1341_v14, %v3066_v45  ;;  %v1345_v25 = vsel %vm1343_vm11, %v1342_v47, %v3067_v44  ;;  %1664 = vrot.lane.b32.xlu1 %v1410_v35, %s3728_s14 }
 0x681   : > { %v1347_v48 = vsel %vm1346_vm13, %v1344_v28, %v3071_v46  ;;  %v1348_v49 = vsel %vm1346_vm13, %v1345_v25, %v3072_v18 }
 0x682   : > { %v1349_v50 = vpack.c.bf16 %v1348_v49, %v1347_v48 }
 0x684   : > { %1536 = vrot.lane.b32.xlu0 %v1349_v50, %s3722_s17  ;;  %1789 = vrot.lane.b32.xlu1 %v1410_v35, %s3741_s6  ;;  %s3742_s17 = smov 72  }
 0x685   : > { %2693 = vmatmul.mubr.msk.bf16.vlgmr.msra.gmra.mrb[8].mxu1 %vm958_vm3, %v1349_v50 }
 0x686   : > { %2698 = vmatprep.mubr.msk.bf16.mxu1 %vm3721_vm2, %v3720_v9 }
 0x688   : > { %1662 = vrot.lane.b32.xlu0 %v1349_v50, %s3728_s14 }
 0x68c   : > { %1787 = vrot.lane.b32.xlu0 %v1349_v50, %s3741_s6 }
 0x6ee   : > { %v1540_v52 = vpop.permute.xlu1 %1539 }
 0x6ef   : > { %v1545_v51 = vsel %vm958_vm3, %v1540_v52, 0 }
 0x6f0   : > { %2703 = vmatpush3.bf16.xpose.msra.mxu0 %v1545_v51 }
 0x6f1   : > { %2714 = vmatprep.subr.bf16.mxu0 %v3720_v9 }
 0x6f2   : > { %v1665_v53 = vpop.permute.xlu1 %1664 }
 0x6f3   : > { %v1670_v55 = vsel %vm958_vm3, %v1665_v53, 0 }
 0x6f6   : > { %v1537_v54 = vpop.permute.xlu0 %1536  ;;  %v1790_v57 = vpop.permute.xlu1 %1789 }
 0x6f7   : > { %2705 = vmatmul.mubr.msk.bf16.vlgmr.msra.gmra.mrb[4].mxu0 %vm958_vm3, %v1537_v54  ;;  %v1795_v59 = vsel %vm958_vm3, %v1790_v57, 0 }
 0x6f8   : > { %2715 = vmatpush3.bf16.xpose.msra.mxu0 %v1670_v55  ;;  %2716 = vmatprep.mubr.msk.bf16.mxu0 %vm3721_vm2, %v3720_v9 }
 0x6f9   : > { %2726 = vmatprep.subr.bf16.mxu0 %v3720_v9 }
 0x6fa   : > { %v1663_v58 = vpop.permute.xlu0 %1662 }
 0x6fe   : > { %v1788_v60 = vpop.permute.xlu0 %1787 }
 0x6ff   : > { %2717 = vmatmul.mubr.msk.bf16.vlgmr.msra.gmra.mrb[8].mxu0 %vm958_vm3, %v1663_v58 }
 0x700   : > { %2727 = vmatpush3.bf16.xpose.msra.mxu0 %v1795_v59  ;;  %2728 = vmatprep.mubr.msk.bf16.mxu0 %vm3721_vm2, %v3720_v9 }
 0x701   : > { %2738 = vmatprep.subr.bf16.mxu0 %v3720_v9 }
 0x707   : > { %2729 = vmatmul.mubr.msk.bf16.vlgmr.msra.gmra.mrb[12].mxu0 %vm958_vm3, %v1788_v60 }
 0x708   : > { %2742 = vmatprep.mubr.msk.bf16.mxu0 %vm3721_vm2, %v3720_v9 }
 0x758   : > { %v1453_v61 = vpop.f32.mrb[8].mxu1 }
 0x759   : > { %v1460_v20 = vmul.f32 0.25, %v1453_v61  ;;  %v2694_v62 = vpop.f32.mrb[9].mxu1 }
 0x75a   : > { %v1456_v63 = vpop.f32.mrb[10].mxu1 }
 0x75b   : > { %v1461_v1 = vmul.f32 0.25, %v1456_v63  ;;  %v2695_v2 = vpop.f32.mrb[11].mxu1  ;;  %v1462_v3 = vadd.f32 %v1460_v20, %v1411_v22 }
 0x75d   : > { %v1464_v4 = vsel %vm958_vm3, %v1462_v3, -inf  ;;  %v1463_v5 = vadd.f32 %v1461_v1, %v1412_v0 }
 0x75e   : > { %1465 = vmax.xlane.f32.xlu1 %v1464_v4 }
 0x75f   : > { %v1467_v6 = vsel %vm958_vm3, %v1463_v5, -inf }
 0x760   : > { %1468 = vmax.xlane.f32.xlu0 %v1467_v6 }
 0x7ca   : > { %v1581_v7 = vpop.f32.mrb[4].mxu0 }
 0x7cb   : > { %v1588_v8 = vmul.f32 0.25, %v1581_v7  ;;  %v2706_v10 = vpop.f32.mrb[5].mxu0 }
 0x7cc   : > { %v1584_v11 = vpop.f32.mrb[6].mxu0 }
 0x7cd   : > { %v1589_v12 = vmul.f32 0.25, %v1584_v11  ;;  %v2707_v13 = vpop.f32.mrb[7].mxu0  ;;  %v1590_v15 = vadd.f32 %v1588_v8, %v1411_v22 }
 0x7cf   : > { %v1592_v16 = vsel %vm958_vm3, %v1590_v15, -inf  ;;  %v1591_v17 = vadd.f32 %v1589_v12, %v1412_v0 }
 0x7d0   : > { %1593 = vmax.xlane.f32.xlu0 %v1592_v16 }
 0x7d1   : > { %v1595_v26 = vsel %vm958_vm3, %v1591_v17, -inf }
 0x7d2   : > { %v1706_v19 = vpop.f32.mrb[8].mxu0 }
 0x7d3   : > { %v1713_v21 = vmul.f32 0.25, %v1706_v19  ;;  %v2718_v23 = vpop.f32.mrb[9].mxu0 }
 0x7d4   : > { %1596 = vmax.xlane.f32.xlu0 %v1595_v26  ;;  %v1709_v27 = vpop.f32.mrb[10].mxu0 }
 0x7d5   : > { %v1714_v29 = vmul.f32 0.25, %v1709_v27  ;;  %v2719_v31 = vpop.f32.mrb[11].mxu0  ;;  %v1715_v32 = vadd.f32 %v1713_v21, %v1411_v22 }
 0x7d7   : > { %v1717_v33 = vsel %vm958_vm3, %v1715_v32, -inf  ;;  %v1716_v34 = vadd.f32 %v1714_v29, %v1412_v0 }
 0x7d8   : > { %1718 = vmax.xlane.f32.xlu1 %v1717_v33 }
 0x7d9   : > { %v1720_v30 = vsel %vm958_vm3, %v1716_v34, -inf }
 0x7da   : > { %1721 = vmax.xlane.f32.xlu0 %v1720_v30  ;;  %v1831_v35 = vpop.f32.mrb[12].mxu0 }
 0x7db   : > { %v1838_v24 = vmul.f32 0.25, %v1831_v35  ;;  %v2730_v36 = vpop.f32.mrb[13].mxu0 }
 0x7dc   : > { %v1834_v37 = vpop.f32.mrb[14].mxu0 }
 0x7dd   : > { %v1839_v38 = vmul.f32 0.25, %v1834_v37  ;;  %v2731_v39 = vpop.f32.mrb[15].mxu0  ;;  %v1840_v40 = vadd.f32 %v1838_v24, %v1411_v22 }
 0x7df   : > { %v1842_v41 = vsel %vm958_vm3, %v1840_v40, -inf  ;;  %v1841_v42 = vadd.f32 %v1839_v38, %v1412_v0 }
 0x7e0   : > { %1843 = vmax.xlane.f32.xlu1 %v1842_v41 }
 0x7e1   : > { %v1845_v43 = vsel %vm958_vm3, %v1841_v42, -inf }
 0x7e2   : > { %1846 = vmax.xlane.f32.xlu0 %v1845_v43 }
 0x7eb   : > { %v1466_v14 = vpop.xlane.xlu1 %1465 }
 0x7ec   : > { %v1470_v28 = vsub.f32 %v1462_v3, %v1466_v14 }
 0x7ed   : > { %v1469_v44 = vpop.xlane.xlu0 %1468 }
 0x7ee   : > { %v1471_v45 = vsub.f32 %v1463_v5, %v1469_v44  ;;  %v1472_v25 = vmul.f32 1.442695, %v1470_v28 }
 0x7f0   : > { %v1474_v18 = vmul.f32 1.442695, %v1471_v45 }
 0x7f1   : > { %1488 = vrot.lane.b32.xlu1 %v4471_v56, %s3728_s14 }
 0x7f2   : > { %3112 = vpow2.f32 %v1474_v18 }
 0x7f3   : > { %3114 = vpow2.f32 %v1472_v25 }
 0x7fc   : > { %v4581_v46 = vpop.eup %3112 }
 0x7fd   : > { %v1479_v47 = vsel %vm958_vm3, %v4581_v46, 0.0  ;;  %v3115_v48 = vpop.eup %3114 }
 0x7fe   : > { %1480 = vadd.xlane.f32.xlu0 %v1479_v47  ;;  %v1476_v49 = vsel %vm958_vm3, %v3115_v48, 0.0 }
 0x815   : > { %1477 = vadd.xlane.f32.xlu1 %v1476_v49 }
 0x85d   : > { %v1594_v50 = vpop.xlane.xlu0 %1593 }
 0x85e   : > { %v1598_v52 = vsub.f32 %v1590_v15, %v1594_v50 }
 0x860   : > { %v1600_v51 = vmul.f32 1.442695, %v1598_v52 }
 0x861   : > { %v1597_v53 = vpop.xlane.xlu0 %1596 }
 0x862   : > { %3116 = vpow2.f32 %v1600_v51  ;;  %v1599_v54 = vsub.f32 %v1591_v17, %v1597_v53 }
 0x864   : > { %v1602_v55 = vmul.f32 1.442695, %v1599_v54 }
 0x865   : > { %v1719_v57 = vpop.xlane.xlu1 %1718 }
 0x866   : > { %3118 = vpow2.f32 %v1602_v55  ;;  %v1723_v58 = vsub.f32 %v1715_v32, %v1719_v57  ;;  %v3092_v57 = vld [vmem:[%s765_s8] sm:$0xff]  }
 0x867   : > { %v1722_v59 = vpop.xlane.xlu0 %1721  ;;  %2739 = vmatpush3.bf16.msra.mxu0 %v3092_v57 }
 0x868   : > { %v1725_v60 = vmul.f32 1.442695, %v1723_v58  ;;  %v1724_v61 = vsub.f32 %v1716_v34, %v1722_v59  ;;  %2740 = vmatprep.subr.bf16.mxu0 %v3720_v9 }
 0x86a   : > { %3120 = vpow2.f32 %v1725_v60  ;;  %v1727_v22 = vmul.f32 1.442695, %v1724_v61 }
 0x86c   : > { %v3117_v20 = vpop.eup %3116  ;;  %3122 = vpow2.f32 %v1727_v22  ;;  %v3093_v22 = vld [vmem:[%s765_s8 + $0x8] sm:$0xff]  }
 0x86d   : > { %v1844_v62 = vpop.xlane.xlu1 %1843  ;;  %v1604_v63 = vsel %vm958_vm3, %v3117_v20, 0.0  ;;  %2741 = vmatpush3.bf16.msra.mxu0 %v3093_v22 }
 0x86e   : > { %v1848_v0 = vsub.f32 %v1840_v40, %v1844_v62  ;;  %1605 = vadd.xlane.f32.xlu1 %v1604_v63  ;;  %2754 = vmatprep.subr.bf16.mxu0 %v3720_v9 }
 0x86f   : > { %v1847_v1 = vpop.xlane.xlu0 %1846 }
 0x870   : > { %v3119_v2 = vpop.eup %3118  ;;  %v1850_v3 = vmul.f32 1.442695, %v1848_v0  ;;  %v1849_v4 = vsub.f32 %v1841_v42, %v1847_v1 }
 0x871   : > { %v1489_v5 = vpop.permute.xlu1 %1488  ;;  %v1607_v6 = vsel %vm958_vm3, %v3119_v2, 0.0 }
 0x872   : > { %3124 = vpow2.f32 %v1850_v3  ;;  %v1852_v7 = vmul.f32 1.442695, %v1849_v4  ;;  %2697 = vmatpush3.bf16.msra.mxu1 %v1489_v5  ;;  %1608 = vadd.xlane.f32.xlu0 %v1607_v6 }
 0x873   : > { %2708 = vmatprep.subr.bf16.mxu1 %v3720_v9 }
 0x874   : > { %v3121_v8 = vpop.eup %3120  ;;  %3126 = vpow2.f32 %v1852_v7 }
 0x875   : > { %v1729_v10 = vsel %vm958_vm3, %v3121_v8, 0.0 }
 0x876   : > { %v3123_v11 = vpop.eup %3122  ;;  %1730 = vadd.xlane.f32.xlu1 %v1729_v10 }
 0x877   : > { %v1732_v12 = vsel %vm958_vm3, %v3123_v11, 0.0 }
 0x878   : > { %1733 = vadd.xlane.f32.xlu0 %v1732_v12 }
 0x87c   : > { %v3125_v13 = vpop.eup %3124 }
 0x87d   : > { %v1854_v15 = vsel %vm958_vm3, %v3125_v13, 0.0 }
 0x87e   : > { %v3127_v16 = vpop.eup %3126  ;;  %1855 = vadd.xlane.f32.xlu1 %v1854_v15 }
 0x87f   : > { %v1857_v17 = vsel %vm958_vm3, %v3127_v16, 0.0 }
 0x880   : > { %1858 = vadd.xlane.f32.xlu0 %v1857_v17 }
 0x88b   : > { %v1481_v19 = vpop.xlane.xlu0 %1480 }
 0x88c   : > { %3128 = vrcp.f32 %v1481_v19 }
 0x88f   : > { %1740 = vrot.lane.b32.xlu1 %v4471_v56, %s3741_s6 }
 0x893   : > { %1865 = vrot.lane.b32.xlu1 %v4471_v56, %s3742_s17 }
 0x896   : > { %1615 = vrot.lane.b32.xlu0 %v4471_v56, %s3743_s24  ;;  %v3129_v23 = vpop.eup %3128 }
 0x897   : > { %v1485_v27 = vmul.f32 %v3129_v23, %v4581_v46 }
 0x8a2   : > { %v1478_v21 = vpop.xlane.xlu1 %1477 }
 0x8a3   : > { %3130 = vrcp.f32 %v1478_v21 }
 0x8ad   : > { %v3131_v26 = vpop.eup %3130 }
 0x8ae   : > { %v1484_v29 = vmul.f32 %v3131_v26, %v3115_v48 }
 0x8b0   : > { %v1486_v31 = vpack.c.bf16 %v1485_v27, %v1484_v29 }
 0x8b2   : > { %2699 = vmatmul.mubr.msk.bf16.vlgmr.msra.gmra.mrb[12].mxu1 %vm958_vm3, %v1486_v31  ;;  %v3156_v31 = vld [vmem:[#allocation2] sm:$0xff] }
 0x8b3   : > { %2710 = vmatprep.mubr.msk.bf16.mxu1 %vm3721_vm2, %v3720_v9 }
 0x8fb   : > { %v1606_v33 = vpop.xlane.xlu1 %1605 }
 0x8ff   : > { %v1609_v32 = vpop.xlane.xlu0 %1608 }
 0x900   : > { %3132 = vrcp.f32 %v1609_v32 }
 0x901   : > { %3134 = vrcp.f32 %v1606_v33 }
 0x903   : > { %v1731_v34 = vpop.xlane.xlu1 %1730 }
 0x905   : > { %v1734_v56 = vpop.xlane.xlu0 %1733 }
 0x906   : > { %3136 = vrcp.f32 %v1734_v56 }
 0x907   : > { %3138 = vrcp.f32 %v1731_v34  ;;  %v3157_v34 = vld [vmem:[#allocation2 + $0x8] sm:$0xff] }
 0x90a   : > { %v3133_v30 = vpop.eup %3132 }
 0x90b   : > { %v3135_v24 = vpop.eup %3134  ;;  %v1613_v36 = vmul.f32 %v3133_v30, %v3119_v2  ;;  %v1856_v37 = vpop.xlane.xlu1 %1855 }
 0x90c   : > { %v1612_v38 = vmul.f32 %v3135_v24, %v3117_v20 }
 0x90d   : > { %v1859_v35 = vpop.xlane.xlu0 %1858 }
 0x90e   : > { %3140 = vrcp.f32 %v1859_v35  ;;  %v1614_v40 = vpack.c.bf16 %v1613_v36, %v1612_v38 }
 0x90f   : > { %3142 = vrcp.f32 %v1856_v37  ;;  %v1741_v42 = vpop.permute.xlu1 %1740 }
 0x910   : > { %v3137_v41 = vpop.eup %3136 }
 0x911   : > { %v1616_v39 = vpop.permute.xlu0 %1615  ;;  %v3139_v43 = vpop.eup %3138  ;;  %v1738_v44 = vmul.f32 %v3137_v41, %v3123_v11  ;;  %v3095_v41 = vld [vmem:[%s774_s18 + $0x8] sm:$0xff]  }
 0x912   : > { %2709 = vmatpush3.bf16.msra.mxu1 %v1616_v39  ;;  %v1737_v45 = vmul.f32 %v3139_v43, %v3121_v8  ;;  %v3094_v39 = vld [vmem:[%s774_s18] sm:$0xff]  }
 0x913   : > { %2720 = vmatprep.subr.bf16.mxu1 %v3720_v9  ;;  %v1866_v14 = vpop.permute.xlu1 %1865 }
 0x914   : > { %v1739_v18 = vpack.c.bf16 %v1738_v44, %v1737_v45 }
 0x915   : > { %2711 = vmatmul.mubr.msk.bf16.vlgmr.msra.gmra.mrb[16].mxu1 %vm958_vm3, %v1614_v40  ;;  %v3158_v40 = vld [vmem:[%s729_s26] ss:$0 sm:$0xff] }
 0x916   : > { %2721 = vmatpush3.bf16.msra.mxu1 %v1741_v42  ;;  %2722 = vmatprep.mubr.msk.bf16.mxu1 %vm3721_vm2, %v3720_v9 }
 0x917   : > { %2732 = vmatprep.subr.bf16.mxu1 %v3720_v9 }
 0x918   : > { %v3141_v46 = vpop.eup %3140 }
 0x919   : > { %v3143_v47 = vpop.eup %3142  ;;  %v1863_v28 = vmul.f32 %v3141_v46, %v3127_v16 }
 0x91a   : > { %v1862_v25 = vmul.f32 %v3143_v47, %v3125_v13 }
 0x91c   : > { %v1864_v48 = vpack.c.bf16 %v1863_v28, %v1862_v25 }
 0x91d   : > { %2723 = vmatmul.mubr.msk.bf16.vlgmr.msra.gmra.mrb[20].mxu1 %vm958_vm3, %v1739_v18 }
 0x91e   : > { %2733 = vmatpush3.bf16.msra.mxu1 %v1866_v14  ;;  %2734 = vmatprep.mubr.msk.bf16.mxu1 %vm3721_vm2, %v3720_v9 }
 0x91f   : > { %2746 = vmatprep.subr.bf16.mxu1 %v3720_v9 }
 0x925   : > { %2735 = vmatmul.mubr.msk.bf16.vlgmr.msra.gmra.mrb[24].mxu1 %vm958_vm3, %v1864_v48 }
 0x926   : > { %2750 = vmatprep.mubr.msk.bf16.mxu1 %vm3721_vm2, %v3720_v9  ;;  %2747 = vmatpush3.bf16.msra.mxu1 %v3094_v39 }
 0x927   : > { %2748 = vmatprep.subr.bf16.mxu1 %v3720_v9 }
 0x92a   : > { %2749 = vmatpush3.bf16.msra.mxu1 %v3095_v41 }
 0x985   : > { %v1528_v49 = vpop.f32.mrb[12].mxu1 }
 0x986   : > { %v2700_v50 = vpop.f32.mrb[13].mxu1 }
 0x987   : > { %v1531_v52 = vpop.f32.mrb[14].mxu1 }
 0x988   : > { %v2701_v51 = vpop.f32.mrb[15].mxu1 }
 0x989   : > { %v3096_v51 = vld [vmem:[%s4379_s25] sm:$0xff]  }
 0x9e8   : > { %v1655_v53 = vpop.f32.mrb[16].mxu1 }
 0x9e9   : > { %v2712_v54 = vpop.f32.mrb[17].mxu1 }
 0x9ea   : > { %v1658_v55 = vpop.f32.mrb[18].mxu1  ;;  %v3098_v54 = vld [vmem:[%s4379_s25 + $0x10] sm:$0xff]  }
 0x9eb   : > { %v3073_v58 = vpack.i.bf16 %v1658_v55, %v1655_v53  ;;  %v2713_v59 = vpop.f32.mrb[19].mxu1  ;;  %v3097_v53 = vld [vmem:[%s4379_s25 + $0x8] sm:$0xff]   ;;  %v3099_v55 = vld [vmem:[%s4379_s25 + $0x18] sm:$0xff]  }
 0x9ed   : > { %3074 = vrot.lane.b32.xlu1 %v3073_v58, %s3731_s21 }
 0x9f0   : > { %v1780_v60 = vpop.f32.mrb[20].mxu1 }
 0x9f1   : > { %v2724_v61 = vpop.f32.mrb[21].mxu1 }
 0x9f2   : > { %v1783_v20 = vpop.f32.mrb[22].mxu1 }
 0x9f3   : > { %v3078_v62 = vpack.i.bf16 %v1783_v20, %v1780_v60  ;;  %v2725_v63 = vpop.f32.mrb[23].mxu1 }
 0x9f5   : > { %3079 = vrot.lane.b32.xlu0 %v3078_v62, %s3734_s22 }
 0x9f8   : > { %v1905_v0 = vpop.f32.mrb[24].mxu1 }
 0x9f9   : > { %v2736_v1 = vpop.f32.mrb[25].mxu1 }
 0x9fa   : > { %v1908_v2 = vpop.f32.mrb[26].mxu1 }
 0x9fb   : > { %v3083_v3 = vpack.i.bf16 %v1908_v2, %v1905_v0  ;;  %v2737_v4 = vpop.f32.mrb[27].mxu1 }
 0x9fd   : > { %3084 = vrot.lane.b32.xlu1 %v3083_v3, %s3733_s28 }
 0xa5f   : > { %v3075_v5 = vpop.permute.xlu1 %3074 }
 0xa60   : > { %v3077_v7 = vunpack.i.h.bf16 %v3075_v5  ;;  %v3076_v8 = vunpack.i.l.bf16 %v3075_v5 }
 0xa62   : > { %v1937_v13 = vsel %vm1318_vm5, %v1531_v52, %v3077_v7  ;;  %v1936_v15 = vsel %vm1318_vm5, %v1528_v49, %v3076_v8 }
 0xa67   : > { %v3080_v6 = vpop.permute.xlu0 %3079 }
 0xa68   : > { %v3082_v10 = vunpack.i.h.bf16 %v3080_v6  ;;  %v3081_v11 = vunpack.i.l.bf16 %v3080_v6 }
 0xa6a   : > { %v1939_v19 = vsel %vm958_vm3, %v1937_v13, %v3082_v10  ;;  %v1938_v21 = vsel %vm958_vm3, %v1936_v15, %v3081_v11 }
 0xa6f   : > { %v3085_v12 = vpop.permute.xlu1 %3084 }
 0xa70   : > { %v3087_v16 = vunpack.i.h.bf16 %v3085_v12  ;;  %v3086_v17 = vunpack.i.l.bf16 %v3085_v12 }
 0xa72   : > { %v1941_v23 = vsel %vm1326_vm7, %v1939_v19, %v3087_v16  ;;  %v1940_v26 = vsel %vm1326_vm7, %v1938_v21, %v3086_v17  ;;  %v3159_v17 = vld [vmem:[#allocation15] sm:$0xff] (!%p2618_p2)   ;;  %v3744_v19 = vmov (!%p2618_p2), 0.0   ;;  %v3160_v21 = vld [vmem:[#allocation15 + $0x8] sm:$0xff] (!%p2618_p2)  }
 0xa73   : > { %v1942_v27 = vpack.c.bf16 %v1941_v23, %v1940_v26 }
 0xa75   : > { %2743 = vmatmul.mubr.msk.bf16.vlgmr.msra.gmra.mrb[16].mxu0 %vm871_vm1, %v1942_v27 }
 0xa76   : > { %2762 = vmatprep.mubr.msk.bf16.mxu0 %vm3721_vm2, %v3720_v9  ;;  %2755 = vmatpush3.bf16.msra.mxu0 %v3096_v51 }
 0xa77   : > { %2756 = vmatprep.subr.bf16.mxu0 %v3720_v9 }
 0xa7a   : > { %2757 = vmatpush3.bf16.msra.mxu0 %v3097_v53 }
 0xa7b   : > { %2758 = vmatprep.subr.bf16.mxu0 %v3720_v9 }
 0xa7e   : > { %2759 = vmatpush3.bf16.msra.mxu0 %v3098_v54 }
 0xa7f   : > { %2760 = vmatprep.subr.bf16.mxu0 %v3720_v9 }
 0xa82   : > { %2761 = vmatpush3.bf16.msra.mxu0 %v3099_v55 }
 0xa83   : > { %2766 = vmatprep.subr.bf16.mxu0 (!%p2618_p2), %v3744_v19 }
 0xb48   : > { %v1996_v29 = vpop.f32.mrb[16].mxu0 }
 0xb49   : > { %v4631_v32 = vadd.f32 %v3156_v31, %v1996_v29  ;;  %v2744_v33 = vpop.f32.mrb[17].mxu0 }
 0xb4a   : > { %v1999_v56 = vpop.f32.mrb[18].mxu0 }
 0xb4b   : > { %v4633_v30 = vadd.f32 %v3157_v34, %v1999_v56  ;;  %v2745_v35 = vpop.f32.mrb[19].mxu0  ;;  %v2005_v24 = vmul.f32 %v4631_v32, %v4631_v32 }
 0xb4d   : > { %v2007_v36 = vsel %vm871_vm1, %v2005_v24, 0.0  ;;  %v2006_v37 = vmul.f32 %v4633_v30, %v4633_v30 }
 0xb4e   : > { %2008 = vadd.xlane.f32.xlu0 %v2007_v36 }
 0xb4f   : > { %v2010_v38 = vsel %vm871_vm1, %v2006_v37, 0.0 }
 0xb50   : > { %2011 = vadd.xlane.f32.xlu1 %v2010_v38 }
 0xb64   : > { %2021 = vrot.lane.b32.xlu0 %v3158_v40, %s3728_s14 }
 0xbdb   : > { %v2009_v42 = vpop.xlane.xlu0 %2008 }
 0xbdc   : > { %v2013_v43 = vmul.f32 0.03125, %v2009_v42 }
 0xbdd   : > { %v2012_v44 = vpop.xlane.xlu1 %2011 }
 0xbde   : > { %v2015_v45 = vadd.f32 1e-06, %v2013_v43  ;;  %v2014_v18 = vmul.f32 0.03125, %v2012_v44 }
 0xbdf   : > { %v2022_v25 = vpop.permute.xlu0 %2021 }
 0xbe0   : > { %3144 = vrsqrt.f32 %v2015_v45  ;;  %v2016_v46 = vadd.f32 1e-06, %v2014_v18 }
 0xbe2   : > { %3146 = vrsqrt.f32 %v2016_v46 }
 0xbea   : > { %v3145_v14 = vpop.eup %3144 }
 0xbeb   : > { %v2019_v47 = vmul.f32 %v3145_v14, %v4631_v32 }
 0xbec   : > { %v3147_v28 = vpop.eup %3146 }
 0xbed   : > { %v2020_v48 = vmul.f32 %v3147_v28, %v4633_v30  ;;  %v2024_v49 = vmul.f32 %v2022_v25, %v2019_v47 }
 0xbef   : > { %v2025_v50 = vmul.f32 %v2022_v25, %v2020_v48 }
 0xbf1   : > { %v2026_v52 = vpack.c.bf16 %v2025_v50, %v2024_v49 }
 0xbf3   : > { %2751 = vmatmul.mubr.msk.bf16.vlgmr.msra.gmra.mrb[28].mxu1 %vm871_vm1, %v2026_v52 }
 0xcc6   : > { %v2080_v57 = vpop.f32.mrb[28].mxu1 }
 0xcc7   : > { %v2611_v58 = vmul.f32 -1.442695, %v2080_v57  ;;  %v2752_v59 = vpop.f32.mrb[29].mxu1 }
 0xcc8   : > { %v2083_v60 = vpop.f32.mrb[30].mxu1 }
 0xcc9   : > { %3148 = vpow2.f32 %v2611_v58  ;;  %v2612_v61 = vmul.f32 -1.442695, %v2083_v60  ;;  %v2753_v22 = vpop.f32.mrb[31].mxu1 }
 0xccb   : > { %3150 = vpow2.f32 %v2612_v61 }
 0xcd3   : > { %v3149_v20 = vpop.eup %3148 }
 0xcd4   : > { %v2093_v62 = vadd.f32 1.0, %v3149_v20 }
 0xcd5   : > { %v3151_v63 = vpop.eup %3150 }
 0xcd6   : > { %3152 = vrcp.f32 %v2093_v62  ;;  %v2094_v0 = vadd.f32 1.0, %v3151_v63 }
 0xcd8   : > { %3154 = vrcp.f32 %v2094_v0 }
 0xce0   : > { %v3153_v1 = vpop.eup %3152 }
 0xce1   : > { %v2099_v3 = vmul.f32 %v3153_v1, %v2080_v57 }
 0xce2   : > { %v3155_v2 = vpop.eup %3154 }
 0xce3   : > { %v2100_v9 = vmul.f32 %v3155_v2, %v2083_v60 }
 0xce5   : > { %v2101_v4 = vpack.c.bf16 %v2100_v9, %v2099_v3 }
 0xce7   : > { %2763 = vmatmul.mubr.msk.bf16.vlgmr.msra.gmra.mrb[20].mxu0 %vm2134_vm14, %v2101_v4 }
 0xce8   : > { %2767 = vmatpush3.bf16.msra.mxu0 (!%p2618_p2), %v3159_v17  ;;  %2770 = vmatprep.mubr.msk.bf16.mxu0 (!%p2618_p2), %vm3745_vm15, %v3744_v19 }
 0xce9   : > { %2768 = vmatprep.subr.bf16.mxu0 (!%p2618_p2), %v3744_v19 }
 0xcec   : > { %2769 = vmatpush3.bf16.msra.mxu0 (!%p2618_p2), %v3160_v21 }
 0xdb9   : > { %2186 = sbr.rel (%p2618_p2) target bundleno = 3902 (0xf3e), region = 148 }
 0xdba   : > { %v2172_v5 = vpop.f32.mrb[20].mxu0 }
 0xdbb   : > { %v2179_v6 = vadd.f32 %v2172_v5, %v4631_v32  ;;  %v2764_v7 = vpop.f32.mrb[21].mxu0 }
 0xdbc   : > { %v2175_v8 = vpop.f32.mrb[22].mxu0 }
 0xdbd   : > { %2181 = vst.msk [vmem:[#allocation2] sm:$0xff] %vm871_vm1, %v2179_v6  ;;  %v2180_v10 = vadd.f32 %v2175_v8, %v4633_v30  ;;  %v2765_v11 = vpop.f32.mrb[23].mxu0  ;;  %v2188_v12 = vmul.f32 (!%p2618_p2), %v2179_v6, %v2179_v6  ;;  %v2619_v30 = vld [vmem:[#allocation14] ss:$0 sm:$0xff] (!%p2618_p2) }
 0xdbf   : > { %2182 = vst.msk [vmem:[#allocation2 + $0x8] sm:$0xff] %vm871_vm1, %v2180_v10  ;;  %v2189_v13 = vmul.f32 (!%p2618_p2), %v2180_v10, %v2180_v10  ;;  %v2190_v15 = vsel (!%p2618_p2), %vm871_vm1, %v2188_v12, 0.0 }
 0xdc0   : > { %2191 = vadd.xlane.f32.xlu0 %v2190_v15 }
 0xdc1   : > { %v2193_v16 = vsel %vm871_vm1, %v2189_v13, 0.0 }
 0xdc4   : > { %2194 = vadd.xlane.f32.xlu0 %v2193_v16 }
 0xe4d   : > { %v2192_v23 = vpop.xlane.xlu0 %2191 }
 0xe4e   : > { %v2196_v26 = vmul.f32 0.03125, %v2192_v23 }
 0xe50   : > { %v2198_v27 = vadd.f32 1e-06, %v2196_v26 }
 0xe51   : > { %v2195_v29 = vpop.xlane.xlu0 %2194 }
 0xe52   : > { %3161 = vrsqrt.f32 %v2198_v27  ;;  %v2197_v31 = vmul.f32 0.03125, %v2195_v29 }
 0xe54   : > { %v2199_v32 = vadd.f32 1e-06, %v2197_v31 }
 0xe56   : > { %3163 = vrsqrt.f32 %v2199_v32 }
 0xe5c   : > { %v3162_v33 = vpop.eup %3161 }
 0xe5d   : > { %v2202_v56 = vmul.f32 %v3162_v33, %v2179_v6 }
 0xe5f   : > { %v2210_v36 = vmul.f32 %v2619_v30, %v2202_v56 }
 0xe60   : > { %v3164_v34 = vpop.eup %3163 }
 0xe61   : > { %v2203_v35 = vmul.f32 %v3164_v34, %v2180_v10 }
 0xe63   : > { %v2211_v24 = vmul.f32 %v2619_v30, %v2203_v35 }
 0xe65   : > { %v2212_v37 = vpack.c.bf16 %v2211_v24, %v2210_v36 }
 0xe67   : > { %2771 = vmatmul.mubr.msk.bf16.vlgmr.msra.gmra.mrb[0].mxu0 %vm871_vm1, %v2212_v37 }
 0xf3a   : > { %v2266_v38 = vpop.f32.mrb[0].mxu0 }
 0xf3b   : > { %2273 = vst [vmem:[#allocation24] sm:$0xff] %v2266_v38  ;;  %v2772_v39 = vpop.f32.mrb[1].mxu0 }
 0xf3c   : > { %v2269_v40 = vpop.f32.mrb[2].mxu0 }
 0xf3d   : > { %2274 = vst [vmem:[#allocation24 + $0x8] sm:$0xff] %v2269_v40  ;;  %v2773_v41 = vpop.f32.mrb[3].mxu0 }
 0xf3e PF: > { %s4829_s26 = sld [smem:[#allocation37_spill]]  ;;  %s3746_s12 = smov [#allocation24]  }
 0xf3f   : > { %s2284_s8 = sshll.u32 %s3746_s12, 4  ;;  %s2285_s8 = int_to_ptr.vmem [resolvable:$true] %s2284_s8 }
 0xf40   : > { %s3599_s18 = scalar_lea.vmem %s2285_s8, 256  ;;  %p3606_p9 = scmp.lt.s32.totalorder %s2285_s8, %s2285_s8 }
 0xf41   : > { %p3600_p5 = scmp.ne.s32.totalorder %s2285_s8, %s3599_s18  ;;  %p3607_p13 = scmp.lt.s32.totalorder %s3599_s18, %s3599_s18 }
 0xf43   : > { %p3608_p0 = por %p3607_p13, %p3606_p9 }
 0xf44   : > { %p2888_p4 = scmp.eq.s32.totalorder %s4829_s26, 1 }
 0xf46   : > { %p3601_p6 = pnand %p3600_p5, %p2888_p4 }
 0xf48   : > { %p3602_p7 = pneg %p3601_p6 }
 0xf4a   : > { %p3609_p12 = pnand %p3608_p0, %p3602_p7 }
 0xf4c   : > { %3612 = shalt.err (!%p3609_p12)
}
 0xf4d   : > { %s4830_s0 = sld [smem:[#allocation51_spill]] }
 0xf53   : > { %s3613_s27 = scalar_lea.hbm %s4830_s0, 256 }
 0xf54   : > { %p3614_p11 = scmp.ne.s32.totalorder %s4830_s0, %s3613_s27  ;;  %p3619_p8 = scmp.lt.u32.totalorder %s3613_s27, %s4830_s0 }
 0xf56   : > { %p3615_p1 = pnand %p3614_p11, %p2888_p4 }
 0xf58   : > { %p3616_p10 = pneg %p3615_p1 }
 0xf5a   : > { %p3621_p3 = pnand %p3619_p8, %p3616_p10 }
 0xf5c   : > { %3624 = shalt.err (!%p3621_p3)
}
 0xf5d   : > { %s3747_s7 = smov 128  }
 0xf5e   : > { %2821 = dma.vmem_to_hbm [thread:$0]  (%p2888_p4), %s2285_s8, 256, %s4830_s0, [#allocation5], %s3747_s7, %s3747_s7, %s3731_s21  }
 0xf5f   : > { %3674 = dma.done.wait (%p2888_p4), [#allocation5], 256  }
 0xf60   : > { %3676 = vsyncadd (%p2888_p4), [#allocation5], 4294967040 }
 0xf61 PF: > { %s4831_s30 = sld [smem:[#allocation36_spill]]  ;;  %s4832_s18 = sld [smem:[#allocation32_spill]] }
 0xf62   : > { %s4833_s19 = sld [smem:[#allocation33_spill]]  ;;  %s4834_s20 = sld [smem:[#allocation41_spill]] }
 0xf63   : > { %s4835_s21 = sld [smem:[#allocation35_spill]]  ;;  %s4836_s22 = sld [smem:[#allocation39_spill]] }
 0xf67   : > { %s31_s23 = sadd.s32 1, %s4831_s30  }
 0xf68   : > { %p28_p2 = scmp.ge.s32.totalorder %s31_s23, 4  }
 0xf6a   :  { %30 = sbr.rel (!%p28_p2) target bundleno = 19 (0x13), region = 224 }
 0xf71   :  { %2300 = vsyncpa [#allocation4], 1 }
 0xf72   :  { %2302 = vsyncpa [#allocation4 + $0x1], 1 }
 0xf73   :  { %2303 = vsyncpa [#allocation7], 1 }
 0xf74   :  { %2304 = vsyncpa [#allocation10], 1 }
 0xf75   :  { %2305 = vsyncpa [#allocation13], 1 }
 0xf76   :  { %2306 = vsyncpa [#allocation16], 1 }
 0xf77   :  { %2307 = vsyncpa [#allocation5], 1 }
 0xf78   :  { %2309 = vsyncpa [#allocation5 + $0x1], 1 }

</bundles_post_ra>
